<compile_context>
chip_gen: v5e
topology: v5e:2x2
jax: 0.10.0
libtpu: 0.0.40
codegen_flags: <defaults>
</compile_context>

<pallas_src>
import functools

import jax
import jax.numpy as jnp
from jax.experimental import pallas as pl
from jax.experimental.pallas import tpu as pltpu

_VMEM_SPEC = pl.BlockSpec(memory_space=pltpu.MemorySpace.VMEM)
_BN_EPS = 1e-5


# -----------------------------------------------------------------------------
# Fused Pallas kernel (factory closes over static T, B, Bp and layer geometry)
# -----------------------------------------------------------------------------

def _make_fused_kernel(T, B, Bp, hidden_sizes, dims, w_offsets):
    n_layers = len(hidden_sizes)
    inv_count = 1.0 / float(T * B)

    def kernel(x_ref, w_ref, vec_ref, o_ref):
        # ---- hoisted, layer-invariant values --------------------------------
        # Gate mask: lanes [2H, 3H) are the tanh ("g") gate, rest are sigmoid.
        g_masks = {}
        for H in set(hidden_sizes):
            lane = jax.lax.broadcasted_iota(jnp.int32, (Bp, 4 * H), 1)
            g_masks[H] = (lane >= 2 * H) & (lane < 3 * H)

        # Valid-row mask: excludes zero-padded batch rows from BN statistics.
        if Bp != B:
            sub = jax.lax.broadcasted_iota(jnp.int32, (Bp, 1), 0)
            bmask = (sub < B).astype(jnp.float32)              # (Bp, 1)
            fmask = jnp.concatenate([bmask] * T, axis=0)       # (T*Bp, 1)
        else:
            fmask = None

        x = x_ref[...]                                         # (T*Bp, D0), time-major

        for l in range(n_layers):
            H = hidden_sizes[l]
            Dp = dims[l]
            r0 = w_offsets[l]
            wih = w_ref[r0:r0 + Dp, 0:4 * H]                   # (Dp, 4H)
            whh = w_ref[r0 + Dp:r0 + Dp + H, 0:4 * H]          # (H, 4H)
            bias = vec_ref[3 * l + 0:3 * l + 1, 0:4 * H]       # (1, 4H)  (bih+bhh)
            gamma = vec_ref[3 * l + 1:3 * l + 2, 0:H]          # (1, H)
            beta = vec_ref[3 * l + 2:3 * l + 3, 0:H]           # (1, H)

            # ---- hoisted input projection for all timesteps, bias folded in
            gx = jnp.dot(x, wih, preferred_element_type=jnp.float32) + bias

            g_mask = g_masks[H]
            h = jnp.zeros((Bp, H), jnp.float32)
            c = jnp.zeros((Bp, H), jnp.float32)
            hs_list = []
            for t in range(T):                                 # fully unrolled, T static
                gates = gx[t * Bp:(t + 1) * Bp, :] + jnp.dot(
                    h, whh, preferred_element_type=jnp.float32)        # (Bp, 4H)
                # Single transcendental pass for all 4 gates:
                #   sigmoid(x) = 0.5 * tanh(0.5 * x) + 0.5   (exact identity)
                th = jnp.tanh(jnp.where(g_mask, gates, 0.5 * gates))
                act = jnp.where(g_mask, th, 0.5 * th + 0.5)
                # Narrow lane slices below lower to XLU rolls (XLU is idle on
                # this path), so they stay off the VALU/EUP critical chain.
                i = act[:, 0 * H:1 * H]
                f = act[:, 1 * H:2 * H]
                g = act[:, 2 * H:3 * H]
                o = act[:, 3 * H:4 * H]
                c = f * c + i * g
                h = o * jnp.tanh(c)
                hs_list.append(h)                              # stays in registers

            hs = jnp.concatenate(hs_list, axis=0)              # (T*Bp, H)

            # ---- BatchNorm1d (training mode, biased variance) over real T*B rows
            if fmask is None:
                mean = jnp.sum(hs, axis=0, keepdims=True) * inv_count
                d = hs - mean
                var = jnp.sum(d * d, axis=0, keepdims=True) * inv_count
            else:
                mean = jnp.sum(hs * fmask, axis=0, keepdims=True) * inv_count
                d = hs - mean
                var = jnp.sum(d * d * fmask, axis=0, keepdims=True) * inv_count
            x = d * (gamma * jax.lax.rsqrt(var + _BN_EPS)) + beta   # input to next layer

        # ---- Final Linear(H_last, 1) on the last timestep --------------------
        H_last = hidden_sizes[-1]
        fc_w = vec_ref[3 * n_layers + 0:3 * n_layers + 1, 0:H_last]   # (1, H)
        fc_b = vec_ref[3 * n_layers + 1:3 * n_layers + 2, 0:1]        # (1, 1)
        h_last = x[(T - 1) * Bp:, :]                                  # (Bp, H)
        out = jnp.sum(h_last * fc_w, axis=-1, keepdims=True) + fc_b   # (Bp, 1)
        o_ref[...] = out[0:B, :]                                      # real batch rows

    return kernel


# -----------------------------------------------------------------------------
# One-time parameter packing (all transposes/casts happen here, not per call)
# -----------------------------------------------------------------------------

def pack_params(params, input_size):
    hidden_sizes = tuple(int(layer["whh"].shape[1]) for layer in params["lstm_layers"])
    dims = (int(input_size),) + hidden_sizes[:-1]
    w4_max = 4 * max(hidden_sizes)

    w_blocks, w_offsets, row = [], [], 0
    for l, layer in enumerate(params["lstm_layers"]):
        H, Dp = hidden_sizes[l], dims[l]
        blk = jnp.concatenate(
            [layer["wih"].T.astype(jnp.float32),               # (Dp, 4H)
             layer["whh"].T.astype(jnp.float32)],              # (H, 4H)
            axis=0)
        blk = jnp.pad(blk, ((0, -(Dp + H) % 8), (0, w4_max - 4 * H)))
        w_offsets.append(row)
        row += blk.shape[0]
        w_blocks.append(blk)
    w_slab = jnp.concatenate(w_blocks, axis=0)                 # (sum rows, 4*Hmax)

    vec_rows = []
    for l, layer in enumerate(params["lstm_layers"]):
        H = hidden_sizes[l]
        vec_rows.append(jnp.pad((layer["bih"] + layer["bhh"]).astype(jnp.float32),
                                (0, w4_max - 4 * H)))
        vec_rows.append(jnp.pad(layer["gamma"].astype(jnp.float32), (0, w4_max - H)))
        vec_rows.append(jnp.pad(layer["beta"].astype(jnp.float32), (0, w4_max - H)))
    vec_rows.append(jnp.pad(params["fc_w"].reshape(-1).astype(jnp.float32),
                            (0, w4_max - hidden_sizes[-1])))
    vec_rows.append(jnp.pad(params["fc_b"].reshape(-1).astype(jnp.float32),
                            (0, w4_max - 1)))
    vec_slab = jnp.stack(vec_rows, axis=0)
    vec_slab = jnp.pad(vec_slab, ((0, -vec_slab.shape[0] % 8), (0, 0)))

    return {
        "w_slab": jax.device_put(w_slab),
        "vec_slab": jax.device_put(vec_slab),
        "hidden_sizes": hidden_sizes,
        "dims": dims,
        "w_offsets": tuple(w_offsets),
    }


# -----------------------------------------------------------------------------
# Forward wrapper: one fused pallas_call (jitted; only x prep remains per call)
# -----------------------------------------------------------------------------

@functools.partial(jax.jit, static_argnums=(3, 4, 5))
def _forward_impl(x_btd, w_slab, vec_slab, hidden_sizes, dims, w_offsets):
    B, T, D = x_btd.shape
    Bp = ((B + 7) // 8) * 8                                    # sublane-aligned batch
    x_t = jnp.transpose(x_btd.astype(jnp.float32), (1, 0, 2))  # (T, B, D) time-major
    if Bp != B:
        x_t = jnp.pad(x_t, ((0, 0), (0, Bp - B), (0, 0)))      # zero pad rows
    x_flat = x_t.reshape(T * Bp, D)                            # row = t*Bp + b

    kernel = _make_fused_kernel(T, B, Bp, hidden_sizes, dims, w_offsets)
    return pl.pallas_call(
        kernel,
        out_shape=jax.ShapeDtypeStruct((B, 1), jnp.float32),
        in_specs=[_VMEM_SPEC, _VMEM_SPEC, _VMEM_SPEC],
        out_specs=_VMEM_SPEC,
    )(x_flat, w_slab, vec_slab)


def lstm_model_forward(x_btd, packed):
    """Full forward pass.  x_btd: (B, T, input_size) batch-first, like PyTorch."""
    return _forward_impl(x_btd, packed["w_slab"], packed["vec_slab"],
                         packed["hidden_sizes"], packed["dims"], packed["w_offsets"])


# -----------------------------------------------------------------------------
# Deterministic parameter init + pure-JAX reference for validation
# -----------------------------------------------------------------------------

def init_params(key, input_size, hidden_sizes):
    params = {"lstm_layers": []}
    d_prev = input_size
    for h in hidden_sizes:
        key, k1, k2, k3, k4 = jax.random.split(key, 5)
        k = 1.0 / jnp.sqrt(h)
        params["lstm_layers"].append({
            "wih": jax.random.uniform(k1, (4 * h, d_prev), jnp.float32, -k, k),
            "whh": jax.random.uniform(k2, (4 * h, h), jnp.float32, -k, k),
            "bih": jax.random.uniform(k3, (4 * h,), jnp.float32, -k, k),
            "bhh": jax.random.uniform(k4, (4 * h,), jnp.float32, -k, k),
            "gamma": jnp.ones((h,), jnp.float32),
            "beta": jnp.zeros((h,), jnp.float32),
        })
        d_prev = h
    key, k5, k6 = jax.random.split(key, 3)
    kf = 1.0 / jnp.sqrt(d_prev)
    params["fc_w"] = jax.random.uniform(k5, (1, d_prev), jnp.float32, -kf, kf)
    params["fc_b"] = jax.random.uniform(k6, (1,), jnp.float32, -kf, kf)
    return params


def reference_forward(x_btd, params):
    x = jnp.transpose(x_btd, (1, 0, 2)).astype(jnp.float32)    # (T, B, D)
    for layer in params["lstm_layers"]:
        wih, whh = layer["wih"], layer["whh"]
        b = layer["bih"] + layer["bhh"]
        H = whh.shape[1]
        B = x.shape[1]

        def step(carry, x_t):
            h, c = carry
            gates = x_t @ wih.T + h @ whh.T + b
            i = jax.nn.sigmoid(gates[:, 0 * H:1 * H])
            f = jax.nn.sigmoid(gates[:, 1 * H:2 * H])
            g = jnp.tanh(gates[:, 2 * H:3 * H])
            o = jax.nn.sigmoid(gates[:, 3 * H:4 * H])
            c = f * c + i * g
            h = o * jnp.tanh(c)
            return (h, c), h

        init = (jnp.zeros((B, H), jnp.float32), jnp.zeros((B, H), jnp.float32))
        _, hs = jax.lax.scan(step, init, x)                    # (T, B, H)
        mean = jnp.mean(hs, axis=(0, 1), keepdims=True)
        var = jnp.mean(jnp.square(hs - mean), axis=(0, 1), keepdims=True)
        x = (hs - mean) * jax.lax.rsqrt(var + _BN_EPS) * layer["gamma"] + layer["beta"]
    return x[-1] @ params["fc_w"].T + params["fc_b"]


# -----------------------------------------------------------------------------
# Main
# -----------------------------------------------------------------------------

if __name__ == "__main__":
    B, T, D = 4, 8, 8
    hidden_sizes = [32, 32]

    key = jax.random.PRNGKey(0)
    key, kx, kp = jax.random.split(key, 3)
    x = jax.random.normal(kx, (B, T, D), jnp.float32)
    params = init_params(kp, D, hidden_sizes)
    packed = pack_params(params, D)            # one-time weight packing

    out = lstm_model_forward(x, packed)
    out = jax.block_until_ready(out)
    assert out.shape == (B, 1), out.shape

    ref = jax.block_until_ready(reference_forward(x, params))
    assert jnp.allclose(out, ref, atol=2e-3, rtol=2e-3), (out, ref)

    print("KERNEL_OK")
</pallas_src>

<mosaic_0001>
module attributes {stable_mosaic.version = 11 : i64} {
  func.func @kernel(%arg0: memref<64x8xf32, #tpu.memory_space<vmem>>, %arg1: memref<104x128xf32, #tpu.memory_space<vmem>>, %arg2: memref<8x128xf32, #tpu.memory_space<vmem>>, %arg3: memref<4x1xf32, #tpu.memory_space<vmem>>) attributes {dimension_semantics = [], scalar_prefetch = 0 : i64, scratch_operands = 0 : i64, tpu.core_type = #tpu.core_type<tc>} {
    %0 = tpu.iota {dimensions = array<i32: 1>} : vector<8x128xi32>
    %c64_i32 = arith.constant 64 : i32
    %1 = vector.broadcast %c64_i32 : i32 to vector<8x128xi32>
    %2 = arith.cmpi sge, %0, %1 : vector<8x128xi32>
    %c96_i32 = arith.constant 96 : i32
    %3 = vector.broadcast %c96_i32 : i32 to vector<8x128xi32>
    %4 = arith.cmpi slt, %0, %3 : vector<8x128xi32>
    %5 = arith.andi %2, %4 : vector<8x128xi1>
    %6 = tpu.iota {dimensions = array<i32: 0>} : vector<8x1xi32>
    %c4_i32 = arith.constant 4 : i32
    %7 = vector.broadcast %c4_i32 : i32 to vector<8x1xi32>
    %8 = arith.cmpi slt, %6, %7 : vector<8x1xi32>
    %9 = arith.extui %8 : vector<8x1xi1> to vector<8x1xi32>
    %10 = arith.sitofp %9 : vector<8x1xi32> to vector<8x1xf32>
    %11 = tpu.concatenate %10, %10, %10, %10, %10, %10, %10, %10 in 0 : vector<8x1xf32>, vector<8x1xf32>, vector<8x1xf32>, vector<8x1xf32>, vector<8x1xf32>, vector<8x1xf32>, vector<8x1xf32>, vector<8x1xf32> -> vector<64x1xf32>
    %c0 = arith.constant 0 : index
    %c0_0 = arith.constant 0 : index
    %12 = vector.load %arg0[%c0, %c0_0] : memref<64x8xf32, #tpu.memory_space<vmem>>, vector<64x8xf32>
    %c0_1 = arith.constant 0 : index
    %c0_2 = arith.constant 0 : index
    %13 = vector.load %arg1[%c0_1, %c0_2] : memref<104x128xf32, #tpu.memory_space<vmem>>, vector<8x128xf32>
    %c8 = arith.constant 8 : index
    %c0_3 = arith.constant 0 : index
    %14 = vector.load %arg1[%c8, %c0_3] : memref<104x128xf32, #tpu.memory_space<vmem>>, vector<32x128xf32>
    %c0_4 = arith.constant 0 : index
    %c0_5 = arith.constant 0 : index
    %15 = vector.load %arg2[%c0_4, %c0_5] : memref<8x128xf32, #tpu.memory_space<vmem>>, vector<1x128xf32>
    %c1 = arith.constant 1 : index
    %c0_6 = arith.constant 0 : index
    %16 = vector.load %arg2[%c1, %c0_6] : memref<8x128xf32, #tpu.memory_space<vmem>>, vector<1x32xf32>
    %c2 = arith.constant 2 : index
    %c0_7 = arith.constant 0 : index
    %17 = vector.load %arg2[%c2, %c0_7] : memref<8x128xf32, #tpu.memory_space<vmem>>, vector<1x32xf32>
    %cst = arith.constant dense<0.000000e+00> : vector<64x128xf32>
    %18 = tpu.matmul %12, %13, %cst {dimension_numbers = #tpu.dot_dimension_numbers<[1], [0], [0], [1], [0, 0, 1, 1], [], []>} : vector<64x8xf32>, vector<8x128xf32>, vector<64x128xf32> -> vector<64x128xf32>
    %19 = vector.broadcast %15 : vector<1x128xf32> to vector<64x128xf32>
    %20 = arith.addf %18, %19 : vector<64x128xf32>
    %cst_8 = arith.constant 0.000000e+00 : f32
    %21 = vector.broadcast %cst_8 : f32 to vector<8x32xf32>
    %cst_9 = arith.constant 0.000000e+00 : f32
    %22 = vector.broadcast %cst_9 : f32 to vector<8x32xf32>
    %23 = vector.extract_strided_slice %20 {offsets = [0, 0], sizes = [8, 128], strides = [1, 1]} : vector<64x128xf32> to vector<8x128xf32>
    %cst_10 = arith.constant dense<0.000000e+00> : vector<8x128xf32>
    %24 = tpu.matmul %21, %14, %cst_10 {dimension_numbers = #tpu.dot_dimension_numbers<[1], [0], [0], [1], [0, 0, 1, 1], [], []>} : vector<8x32xf32>, vector<32x128xf32>, vector<8x128xf32> -> vector<8x128xf32>
    %25 = arith.addf %23, %24 : vector<8x128xf32>
    %cst_11 = arith.constant 5.000000e-01 : f32
    %26 = vector.broadcast %cst_11 : f32 to vector<8x128xf32>
    %27 = arith.mulf %26, %25 : vector<8x128xf32>
    %28 = arith.select %5, %25, %27 : vector<8x128xi1>, vector<8x128xf32>
    %29 = math.tanh %28 : vector<8x128xf32>
    %cst_12 = arith.constant 5.000000e-01 : f32
    %30 = vector.broadcast %cst_12 : f32 to vector<8x128xf32>
    %31 = arith.mulf %30, %29 : vector<8x128xf32>
    %cst_13 = arith.constant 5.000000e-01 : f32
    %32 = vector.broadcast %cst_13 : f32 to vector<8x128xf32>
    %33 = arith.addf %31, %32 : vector<8x128xf32>
    %34 = arith.select %5, %29, %33 : vector<8x128xi1>, vector<8x128xf32>
    %35 = vector.extract_strided_slice %34 {offsets = [0, 0], sizes = [8, 32], strides = [1, 1]} : vector<8x128xf32> to vector<8x32xf32>
    %36 = vector.extract_strided_slice %34 {offsets = [0, 32], sizes = [8, 32], strides = [1, 1]} : vector<8x128xf32> to vector<8x32xf32>
    %37 = vector.extract_strided_slice %34 {offsets = [0, 64], sizes = [8, 32], strides = [1, 1]} : vector<8x128xf32> to vector<8x32xf32>
    %38 = vector.extract_strided_slice %34 {offsets = [0, 96], sizes = [8, 32], strides = [1, 1]} : vector<8x128xf32> to vector<8x32xf32>
    %39 = arith.mulf %36, %22 : vector<8x32xf32>
    %40 = arith.mulf %35, %37 : vector<8x32xf32>
    %41 = arith.addf %39, %40 : vector<8x32xf32>
    %42 = math.tanh %41 : vector<8x32xf32>
    %43 = arith.mulf %38, %42 : vector<8x32xf32>
    %44 = vector.extract_strided_slice %20 {offsets = [8, 0], sizes = [8, 128], strides = [1, 1]} : vector<64x128xf32> to vector<8x128xf32>
    %cst_14 = arith.constant dense<0.000000e+00> : vector<8x128xf32>
    %45 = tpu.matmul %43, %14, %cst_14 {dimension_numbers = #tpu.dot_dimension_numbers<[1], [0], [0], [1], [0, 0, 1, 1], [], []>} : vector<8x32xf32>, vector<32x128xf32>, vector<8x128xf32> -> vector<8x128xf32>
    %46 = arith.addf %44, %45 : vector<8x128xf32>
    %cst_15 = arith.constant 5.000000e-01 : f32
    %47 = vector.broadcast %cst_15 : f32 to vector<8x128xf32>
    %48 = arith.mulf %47, %46 : vector<8x128xf32>
    %49 = arith.select %5, %46, %48 : vector<8x128xi1>, vector<8x128xf32>
    %50 = math.tanh %49 : vector<8x128xf32>
    %cst_16 = arith.constant 5.000000e-01 : f32
    %51 = vector.broadcast %cst_16 : f32 to vector<8x128xf32>
    %52 = arith.mulf %51, %50 : vector<8x128xf32>
    %cst_17 = arith.constant 5.000000e-01 : f32
    %53 = vector.broadcast %cst_17 : f32 to vector<8x128xf32>
    %54 = arith.addf %52, %53 : vector<8x128xf32>
    %55 = arith.select %5, %50, %54 : vector<8x128xi1>, vector<8x128xf32>
    %56 = vector.extract_strided_slice %55 {offsets = [0, 0], sizes = [8, 32], strides = [1, 1]} : vector<8x128xf32> to vector<8x32xf32>
    %57 = vector.extract_strided_slice %55 {offsets = [0, 32], sizes = [8, 32], strides = [1, 1]} : vector<8x128xf32> to vector<8x32xf32>
    %58 = vector.extract_strided_slice %55 {offsets = [0, 64], sizes = [8, 32], strides = [1, 1]} : vector<8x128xf32> to vector<8x32xf32>
    %59 = vector.extract_strided_slice %55 {offsets = [0, 96], sizes = [8, 32], strides = [1, 1]} : vector<8x128xf32> to vector<8x32xf32>
    %60 = arith.mulf %57, %41 : vector<8x32xf32>
    %61 = arith.mulf %56, %58 : vector<8x32xf32>
    %62 = arith.addf %60, %61 : vector<8x32xf32>
    %63 = math.tanh %62 : vector<8x32xf32>
    %64 = arith.mulf %59, %63 : vector<8x32xf32>
    %65 = vector.extract_strided_slice %20 {offsets = [16, 0], sizes = [8, 128], strides = [1, 1]} : vector<64x128xf32> to vector<8x128xf32>
    %cst_18 = arith.constant dense<0.000000e+00> : vector<8x128xf32>
    %66 = tpu.matmul %64, %14, %cst_18 {dimension_numbers = #tpu.dot_dimension_numbers<[1], [0], [0], [1], [0, 0, 1, 1], [], []>} : vector<8x32xf32>, vector<32x128xf32>, vector<8x128xf32> -> vector<8x128xf32>
    %67 = arith.addf %65, %66 : vector<8x128xf32>
    %cst_19 = arith.constant 5.000000e-01 : f32
    %68 = vector.broadcast %cst_19 : f32 to vector<8x128xf32>
    %69 = arith.mulf %68, %67 : vector<8x128xf32>
    %70 = arith.select %5, %67, %69 : vector<8x128xi1>, vector<8x128xf32>
    %71 = math.tanh %70 : vector<8x128xf32>
    %cst_20 = arith.constant 5.000000e-01 : f32
    %72 = vector.broadcast %cst_20 : f32 to vector<8x128xf32>
    %73 = arith.mulf %72, %71 : vector<8x128xf32>
    %cst_21 = arith.constant 5.000000e-01 : f32
    %74 = vector.broadcast %cst_21 : f32 to vector<8x128xf32>
    %75 = arith.addf %73, %74 : vector<8x128xf32>
    %76 = arith.select %5, %71, %75 : vector<8x128xi1>, vector<8x128xf32>
    %77 = vector.extract_strided_slice %76 {offsets = [0, 0], sizes = [8, 32], strides = [1, 1]} : vector<8x128xf32> to vector<8x32xf32>
    %78 = vector.extract_strided_slice %76 {offsets = [0, 32], sizes = [8, 32], strides = [1, 1]} : vector<8x128xf32> to vector<8x32xf32>
    %79 = vector.extract_strided_slice %76 {offsets = [0, 64], sizes = [8, 32], strides = [1, 1]} : vector<8x128xf32> to vector<8x32xf32>
    %80 = vector.extract_strided_slice %76 {offsets = [0, 96], sizes = [8, 32], strides = [1, 1]} : vector<8x128xf32> to vector<8x32xf32>
    %81 = arith.mulf %78, %62 : vector<8x32xf32>
    %82 = arith.mulf %77, %79 : vector<8x32xf32>
    %83 = arith.addf %81, %82 : vector<8x32xf32>
    %84 = math.tanh %83 : vector<8x32xf32>
    %85 = arith.mulf %80, %84 : vector<8x32xf32>
    %86 = vector.extract_strided_slice %20 {offsets = [24, 0], sizes = [8, 128], strides = [1, 1]} : vector<64x128xf32> to vector<8x128xf32>
    %cst_22 = arith.constant dense<0.000000e+00> : vector<8x128xf32>
    %87 = tpu.matmul %85, %14, %cst_22 {dimension_numbers = #tpu.dot_dimension_numbers<[1], [0], [0], [1], [0, 0, 1, 1], [], []>} : vector<8x32xf32>, vector<32x128xf32>, vector<8x128xf32> -> vector<8x128xf32>
    %88 = arith.addf %86, %87 : vector<8x128xf32>
    %cst_23 = arith.constant 5.000000e-01 : f32
    %89 = vector.broadcast %cst_23 : f32 to vector<8x128xf32>
    %90 = arith.mulf %89, %88 : vector<8x128xf32>
    %91 = arith.select %5, %88, %90 : vector<8x128xi1>, vector<8x128xf32>
    %92 = math.tanh %91 : vector<8x128xf32>
    %cst_24 = arith.constant 5.000000e-01 : f32
    %93 = vector.broadcast %cst_24 : f32 to vector<8x128xf32>
    %94 = arith.mulf %93, %92 : vector<8x128xf32>
    %cst_25 = arith.constant 5.000000e-01 : f32
    %95 = vector.broadcast %cst_25 : f32 to vector<8x128xf32>
    %96 = arith.addf %94, %95 : vector<8x128xf32>
    %97 = arith.select %5, %92, %96 : vector<8x128xi1>, vector<8x128xf32>
    %98 = vector.extract_strided_slice %97 {offsets = [0, 0], sizes = [8, 32], strides = [1, 1]} : vector<8x128xf32> to vector<8x32xf32>
    %99 = vector.extract_strided_slice %97 {offsets = [0, 32], sizes = [8, 32], strides = [1, 1]} : vector<8x128xf32> to vector<8x32xf32>
    %100 = vector.extract_strided_slice %97 {offsets = [0, 64], sizes = [8, 32], strides = [1, 1]} : vector<8x128xf32> to vector<8x32xf32>
    %101 = vector.extract_strided_slice %97 {offsets = [0, 96], sizes = [8, 32], strides = [1, 1]} : vector<8x128xf32> to vector<8x32xf32>
    %102 = arith.mulf %99, %83 : vector<8x32xf32>
    %103 = arith.mulf %98, %100 : vector<8x32xf32>
    %104 = arith.addf %102, %103 : vector<8x32xf32>
    %105 = math.tanh %104 : vector<8x32xf32>
    %106 = arith.mulf %101, %105 : vector<8x32xf32>
    %107 = vector.extract_strided_slice %20 {offsets = [32, 0], sizes = [8, 128], strides = [1, 1]} : vector<64x128xf32> to vector<8x128xf32>
    %cst_26 = arith.constant dense<0.000000e+00> : vector<8x128xf32>
    %108 = tpu.matmul %106, %14, %cst_26 {dimension_numbers = #tpu.dot_dimension_numbers<[1], [0], [0], [1], [0, 0, 1, 1], [], []>} : vector<8x32xf32>, vector<32x128xf32>, vector<8x128xf32> -> vector<8x128xf32>
    %109 = arith.addf %107, %108 : vector<8x128xf32>
    %cst_27 = arith.constant 5.000000e-01 : f32
    %110 = vector.broadcast %cst_27 : f32 to vector<8x128xf32>
    %111 = arith.mulf %110, %109 : vector<8x128xf32>
    %112 = arith.select %5, %109, %111 : vector<8x128xi1>, vector<8x128xf32>
    %113 = math.tanh %112 : vector<8x128xf32>
    %cst_28 = arith.constant 5.000000e-01 : f32
    %114 = vector.broadcast %cst_28 : f32 to vector<8x128xf32>
    %115 = arith.mulf %114, %113 : vector<8x128xf32>
    %cst_29 = arith.constant 5.000000e-01 : f32
    %116 = vector.broadcast %cst_29 : f32 to vector<8x128xf32>
    %117 = arith.addf %115, %116 : vector<8x128xf32>
    %118 = arith.select %5, %113, %117 : vector<8x128xi1>, vector<8x128xf32>
    %119 = vector.extract_strided_slice %118 {offsets = [0, 0], sizes = [8, 32], strides = [1, 1]} : vector<8x128xf32> to vector<8x32xf32>
    %120 = vector.extract_strided_slice %118 {offsets = [0, 32], sizes = [8, 32], strides = [1, 1]} : vector<8x128xf32> to vector<8x32xf32>
    %121 = vector.extract_strided_slice %118 {offsets = [0, 64], sizes = [8, 32], strides = [1, 1]} : vector<8x128xf32> to vector<8x32xf32>
    %122 = vector.extract_strided_slice %118 {offsets = [0, 96], sizes = [8, 32], strides = [1, 1]} : vector<8x128xf32> to vector<8x32xf32>
    %123 = arith.mulf %120, %104 : vector<8x32xf32>
    %124 = arith.mulf %119, %121 : vector<8x32xf32>
    %125 = arith.addf %123, %124 : vector<8x32xf32>
    %126 = math.tanh %125 : vector<8x32xf32>
    %127 = arith.mulf %122, %126 : vector<8x32xf32>
    %128 = vector.extract_strided_slice %20 {offsets = [40, 0], sizes = [8, 128], strides = [1, 1]} : vector<64x128xf32> to vector<8x128xf32>
    %cst_30 = arith.constant dense<0.000000e+00> : vector<8x128xf32>
    %129 = tpu.matmul %127, %14, %cst_30 {dimension_numbers = #tpu.dot_dimension_numbers<[1], [0], [0], [1], [0, 0, 1, 1], [], []>} : vector<8x32xf32>, vector<32x128xf32>, vector<8x128xf32> -> vector<8x128xf32>
    %130 = arith.addf %128, %129 : vector<8x128xf32>
    %cst_31 = arith.constant 5.000000e-01 : f32
    %131 = vector.broadcast %cst_31 : f32 to vector<8x128xf32>
    %132 = arith.mulf %131, %130 : vector<8x128xf32>
    %133 = arith.select %5, %130, %132 : vector<8x128xi1>, vector<8x128xf32>
    %134 = math.tanh %133 : vector<8x128xf32>
    %cst_32 = arith.constant 5.000000e-01 : f32
    %135 = vector.broadcast %cst_32 : f32 to vector<8x128xf32>
    %136 = arith.mulf %135, %134 : vector<8x128xf32>
    %cst_33 = arith.constant 5.000000e-01 : f32
    %137 = vector.broadcast %cst_33 : f32 to vector<8x128xf32>
    %138 = arith.addf %136, %137 : vector<8x128xf32>
    %139 = arith.select %5, %134, %138 : vector<8x128xi1>, vector<8x128xf32>
    %140 = vector.extract_strided_slice %139 {offsets = [0, 0], sizes = [8, 32], strides = [1, 1]} : vector<8x128xf32> to vector<8x32xf32>
    %141 = vector.extract_strided_slice %139 {offsets = [0, 32], sizes = [8, 32], strides = [1, 1]} : vector<8x128xf32> to vector<8x32xf32>
    %142 = vector.extract_strided_slice %139 {offsets = [0, 64], sizes = [8, 32], strides = [1, 1]} : vector<8x128xf32> to vector<8x32xf32>
    %143 = vector.extract_strided_slice %139 {offsets = [0, 96], sizes = [8, 32], strides = [1, 1]} : vector<8x128xf32> to vector<8x32xf32>
    %144 = arith.mulf %141, %125 : vector<8x32xf32>
    %145 = arith.mulf %140, %142 : vector<8x32xf32>
    %146 = arith.addf %144, %145 : vector<8x32xf32>
    %147 = math.tanh %146 : vector<8x32xf32>
    %148 = arith.mulf %143, %147 : vector<8x32xf32>
    %149 = vector.extract_strided_slice %20 {offsets = [48, 0], sizes = [8, 128], strides = [1, 1]} : vector<64x128xf32> to vector<8x128xf32>
    %cst_34 = arith.constant dense<0.000000e+00> : vector<8x128xf32>
    %150 = tpu.matmul %148, %14, %cst_34 {dimension_numbers = #tpu.dot_dimension_numbers<[1], [0], [0], [1], [0, 0, 1, 1], [], []>} : vector<8x32xf32>, vector<32x128xf32>, vector<8x128xf32> -> vector<8x128xf32>
    %151 = arith.addf %149, %150 : vector<8x128xf32>
    %cst_35 = arith.constant 5.000000e-01 : f32
    %152 = vector.broadcast %cst_35 : f32 to vector<8x128xf32>
    %153 = arith.mulf %152, %151 : vector<8x128xf32>
    %154 = arith.select %5, %151, %153 : vector<8x128xi1>, vector<8x128xf32>
    %155 = math.tanh %154 : vector<8x128xf32>
    %cst_36 = arith.constant 5.000000e-01 : f32
    %156 = vector.broadcast %cst_36 : f32 to vector<8x128xf32>
    %157 = arith.mulf %156, %155 : vector<8x128xf32>
    %cst_37 = arith.constant 5.000000e-01 : f32
    %158 = vector.broadcast %cst_37 : f32 to vector<8x128xf32>
    %159 = arith.addf %157, %158 : vector<8x128xf32>
    %160 = arith.select %5, %155, %159 : vector<8x128xi1>, vector<8x128xf32>
    %161 = vector.extract_strided_slice %160 {offsets = [0, 0], sizes = [8, 32], strides = [1, 1]} : vector<8x128xf32> to vector<8x32xf32>
    %162 = vector.extract_strided_slice %160 {offsets = [0, 32], sizes = [8, 32], strides = [1, 1]} : vector<8x128xf32> to vector<8x32xf32>
    %163 = vector.extract_strided_slice %160 {offsets = [0, 64], sizes = [8, 32], strides = [1, 1]} : vector<8x128xf32> to vector<8x32xf32>
    %164 = vector.extract_strided_slice %160 {offsets = [0, 96], sizes = [8, 32], strides = [1, 1]} : vector<8x128xf32> to vector<8x32xf32>
    %165 = arith.mulf %162, %146 : vector<8x32xf32>
    %166 = arith.mulf %161, %163 : vector<8x32xf32>
    %167 = arith.addf %165, %166 : vector<8x32xf32>
    %168 = math.tanh %167 : vector<8x32xf32>
    %169 = arith.mulf %164, %168 : vector<8x32xf32>
    %170 = vector.extract_strided_slice %20 {offsets = [56, 0], sizes = [8, 128], strides = [1, 1]} : vector<64x128xf32> to vector<8x128xf32>
    %cst_38 = arith.constant dense<0.000000e+00> : vector<8x128xf32>
    %171 = tpu.matmul %169, %14, %cst_38 {dimension_numbers = #tpu.dot_dimension_numbers<[1], [0], [0], [1], [0, 0, 1, 1], [], []>} : vector<8x32xf32>, vector<32x128xf32>, vector<8x128xf32> -> vector<8x128xf32>
    %172 = arith.addf %170, %171 : vector<8x128xf32>
    %cst_39 = arith.constant 5.000000e-01 : f32
    %173 = vector.broadcast %cst_39 : f32 to vector<8x128xf32>
    %174 = arith.mulf %173, %172 : vector<8x128xf32>
    %175 = arith.select %5, %172, %174 : vector<8x128xi1>, vector<8x128xf32>
    %176 = math.tanh %175 : vector<8x128xf32>
    %cst_40 = arith.constant 5.000000e-01 : f32
    %177 = vector.broadcast %cst_40 : f32 to vector<8x128xf32>
    %178 = arith.mulf %177, %176 : vector<8x128xf32>
    %cst_41 = arith.constant 5.000000e-01 : f32
    %179 = vector.broadcast %cst_41 : f32 to vector<8x128xf32>
    %180 = arith.addf %178, %179 : vector<8x128xf32>
    %181 = arith.select %5, %176, %180 : vector<8x128xi1>, vector<8x128xf32>
    %182 = vector.extract_strided_slice %181 {offsets = [0, 0], sizes = [8, 32], strides = [1, 1]} : vector<8x128xf32> to vector<8x32xf32>
    %183 = vector.extract_strided_slice %181 {offsets = [0, 32], sizes = [8, 32], strides = [1, 1]} : vector<8x128xf32> to vector<8x32xf32>
    %184 = vector.extract_strided_slice %181 {offsets = [0, 64], sizes = [8, 32], strides = [1, 1]} : vector<8x128xf32> to vector<8x32xf32>
    %185 = vector.extract_strided_slice %181 {offsets = [0, 96], sizes = [8, 32], strides = [1, 1]} : vector<8x128xf32> to vector<8x32xf32>
    %186 = arith.mulf %183, %167 : vector<8x32xf32>
    %187 = arith.mulf %182, %184 : vector<8x32xf32>
    %188 = arith.addf %186, %187 : vector<8x32xf32>
    %189 = math.tanh %188 : vector<8x32xf32>
    %190 = arith.mulf %185, %189 : vector<8x32xf32>
    %191 = tpu.concatenate %43, %64, %85, %106, %127, %148, %169, %190 in 0 : vector<8x32xf32>, vector<8x32xf32>, vector<8x32xf32>, vector<8x32xf32>, vector<8x32xf32>, vector<8x32xf32>, vector<8x32xf32>, vector<8x32xf32> -> vector<64x32xf32>
    %192 = vector.broadcast %11 : vector<64x1xf32> to vector<64x32xf32>
    %193 = arith.mulf %191, %192 : vector<64x32xf32>
    %cst_42 = arith.constant dense<0.000000e+00> : vector<32xf32>
    %194 = vector.multi_reduction <add>, %193, %cst_42 [0] : vector<64x32xf32> to vector<32xf32>
    %195 = vector.shape_cast %194 : vector<32xf32> to vector<1x32xf32>
    %cst_43 = arith.constant 3.125000e-02 : f32
    %196 = vector.broadcast %cst_43 : f32 to vector<1x32xf32>
    %197 = arith.mulf %195, %196 : vector<1x32xf32>
    %198 = vector.broadcast %197 : vector<1x32xf32> to vector<64x32xf32>
    %199 = arith.subf %191, %198 : vector<64x32xf32>
    %200 = arith.mulf %199, %199 : vector<64x32xf32>
    %201 = vector.broadcast %11 : vector<64x1xf32> to vector<64x32xf32>
    %202 = arith.mulf %200, %201 : vector<64x32xf32>
    %cst_44 = arith.constant dense<0.000000e+00> : vector<32xf32>
    %203 = vector.multi_reduction <add>, %202, %cst_44 [0] : vector<64x32xf32> to vector<32xf32>
    %204 = vector.shape_cast %203 : vector<32xf32> to vector<1x32xf32>
    %cst_45 = arith.constant 3.125000e-02 : f32
    %205 = vector.broadcast %cst_45 : f32 to vector<1x32xf32>
    %206 = arith.mulf %204, %205 : vector<1x32xf32>
    %cst_46 = arith.constant 9.99999974E-6 : f32
    %207 = vector.broadcast %cst_46 : f32 to vector<1x32xf32>
    %208 = arith.addf %206, %207 : vector<1x32xf32>
    %209 = math.rsqrt %208 : vector<1x32xf32>
    %210 = arith.mulf %16, %209 : vector<1x32xf32>
    %211 = vector.broadcast %210 : vector<1x32xf32> to vector<64x32xf32>
    %212 = arith.mulf %199, %211 : vector<64x32xf32>
    %213 = vector.broadcast %17 : vector<1x32xf32> to vector<64x32xf32>
    %214 = arith.addf %212, %213 : vector<64x32xf32>
    %c40 = arith.constant 40 : index
    %c0_47 = arith.constant 0 : index
    %215 = vector.load %arg1[%c40, %c0_47] : memref<104x128xf32, #tpu.memory_space<vmem>>, vector<32x128xf32>
    %c72 = arith.constant 72 : index
    %c0_48 = arith.constant 0 : index
    %216 = vector.load %arg1[%c72, %c0_48] : memref<104x128xf32, #tpu.memory_space<vmem>>, vector<32x128xf32>
    %c3 = arith.constant 3 : index
    %c0_49 = arith.constant 0 : index
    %217 = vector.load %arg2[%c3, %c0_49] : memref<8x128xf32, #tpu.memory_space<vmem>>, vector<1x128xf32>
    %c4 = arith.constant 4 : index
    %c0_50 = arith.constant 0 : index
    %218 = vector.load %arg2[%c4, %c0_50] : memref<8x128xf32, #tpu.memory_space<vmem>>, vector<1x32xf32>
    %c5 = arith.constant 5 : index
    %c0_51 = arith.constant 0 : index
    %219 = vector.load %arg2[%c5, %c0_51] : memref<8x128xf32, #tpu.memory_space<vmem>>, vector<1x32xf32>
    %cst_52 = arith.constant dense<0.000000e+00> : vector<64x128xf32>
    %220 = tpu.matmul %214, %215, %cst_52 {dimension_numbers = #tpu.dot_dimension_numbers<[1], [0], [0], [1], [0, 0, 1, 1], [], []>} : vector<64x32xf32>, vector<32x128xf32>, vector<64x128xf32> -> vector<64x128xf32>
    %221 = vector.broadcast %217 : vector<1x128xf32> to vector<64x128xf32>
    %222 = arith.addf %220, %221 : vector<64x128xf32>
    %cst_53 = arith.constant 0.000000e+00 : f32
    %223 = vector.broadcast %cst_53 : f32 to vector<8x32xf32>
    %cst_54 = arith.constant 0.000000e+00 : f32
    %224 = vector.broadcast %cst_54 : f32 to vector<8x32xf32>
    %225 = vector.extract_strided_slice %222 {offsets = [0, 0], sizes = [8, 128], strides = [1, 1]} : vector<64x128xf32> to vector<8x128xf32>
    %cst_55 = arith.constant dense<0.000000e+00> : vector<8x128xf32>
    %226 = tpu.matmul %223, %216, %cst_55 {dimension_numbers = #tpu.dot_dimension_numbers<[1], [0], [0], [1], [0, 0, 1, 1], [], []>} : vector<8x32xf32>, vector<32x128xf32>, vector<8x128xf32> -> vector<8x128xf32>
    %227 = arith.addf %225, %226 : vector<8x128xf32>
    %cst_56 = arith.constant 5.000000e-01 : f32
    %228 = vector.broadcast %cst_56 : f32 to vector<8x128xf32>
    %229 = arith.mulf %228, %227 : vector<8x128xf32>
    %230 = arith.select %5, %227, %229 : vector<8x128xi1>, vector<8x128xf32>
    %231 = math.tanh %230 : vector<8x128xf32>
    %cst_57 = arith.constant 5.000000e-01 : f32
    %232 = vector.broadcast %cst_57 : f32 to vector<8x128xf32>
    %233 = arith.mulf %232, %231 : vector<8x128xf32>
    %cst_58 = arith.constant 5.000000e-01 : f32
    %234 = vector.broadcast %cst_58 : f32 to vector<8x128xf32>
    %235 = arith.addf %233, %234 : vector<8x128xf32>
    %236 = arith.select %5, %231, %235 : vector<8x128xi1>, vector<8x128xf32>
    %237 = vector.extract_strided_slice %236 {offsets = [0, 0], sizes = [8, 32], strides = [1, 1]} : vector<8x128xf32> to vector<8x32xf32>
    %238 = vector.extract_strided_slice %236 {offsets = [0, 32], sizes = [8, 32], strides = [1, 1]} : vector<8x128xf32> to vector<8x32xf32>
    %239 = vector.extract_strided_slice %236 {offsets = [0, 64], sizes = [8, 32], strides = [1, 1]} : vector<8x128xf32> to vector<8x32xf32>
    %240 = vector.extract_strided_slice %236 {offsets = [0, 96], sizes = [8, 32], strides = [1, 1]} : vector<8x128xf32> to vector<8x32xf32>
    %241 = arith.mulf %238, %224 : vector<8x32xf32>
    %242 = arith.mulf %237, %239 : vector<8x32xf32>
    %243 = arith.addf %241, %242 : vector<8x32xf32>
    %244 = math.tanh %243 : vector<8x32xf32>
    %245 = arith.mulf %240, %244 : vector<8x32xf32>
    %246 = vector.extract_strided_slice %222 {offsets = [8, 0], sizes = [8, 128], strides = [1, 1]} : vector<64x128xf32> to vector<8x128xf32>
    %cst_59 = arith.constant dense<0.000000e+00> : vector<8x128xf32>
    %247 = tpu.matmul %245, %216, %cst_59 {dimension_numbers = #tpu.dot_dimension_numbers<[1], [0], [0], [1], [0, 0, 1, 1], [], []>} : vector<8x32xf32>, vector<32x128xf32>, vector<8x128xf32> -> vector<8x128xf32>
    %248 = arith.addf %246, %247 : vector<8x128xf32>
    %cst_60 = arith.constant 5.000000e-01 : f32
    %249 = vector.broadcast %cst_60 : f32 to vector<8x128xf32>
    %250 = arith.mulf %249, %248 : vector<8x128xf32>
    %251 = arith.select %5, %248, %250 : vector<8x128xi1>, vector<8x128xf32>
    %252 = math.tanh %251 : vector<8x128xf32>
    %cst_61 = arith.constant 5.000000e-01 : f32
    %253 = vector.broadcast %cst_61 : f32 to vector<8x128xf32>
    %254 = arith.mulf %253, %252 : vector<8x128xf32>
    %cst_62 = arith.constant 5.000000e-01 : f32
    %255 = vector.broadcast %cst_62 : f32 to vector<8x128xf32>
    %256 = arith.addf %254, %255 : vector<8x128xf32>
    %257 = arith.select %5, %252, %256 : vector<8x128xi1>, vector<8x128xf32>
    %258 = vector.extract_strided_slice %257 {offsets = [0, 0], sizes = [8, 32], strides = [1, 1]} : vector<8x128xf32> to vector<8x32xf32>
    %259 = vector.extract_strided_slice %257 {offsets = [0, 32], sizes = [8, 32], strides = [1, 1]} : vector<8x128xf32> to vector<8x32xf32>
    %260 = vector.extract_strided_slice %257 {offsets = [0, 64], sizes = [8, 32], strides = [1, 1]} : vector<8x128xf32> to vector<8x32xf32>
    %261 = vector.extract_strided_slice %257 {offsets = [0, 96], sizes = [8, 32], strides = [1, 1]} : vector<8x128xf32> to vector<8x32xf32>
    %262 = arith.mulf %259, %243 : vector<8x32xf32>
    %263 = arith.mulf %258, %260 : vector<8x32xf32>
    %264 = arith.addf %262, %263 : vector<8x32xf32>
    %265 = math.tanh %264 : vector<8x32xf32>
    %266 = arith.mulf %261, %265 : vector<8x32xf32>
    %267 = vector.extract_strided_slice %222 {offsets = [16, 0], sizes = [8, 128], strides = [1, 1]} : vector<64x128xf32> to vector<8x128xf32>
    %cst_63 = arith.constant dense<0.000000e+00> : vector<8x128xf32>
    %268 = tpu.matmul %266, %216, %cst_63 {dimension_numbers = #tpu.dot_dimension_numbers<[1], [0], [0], [1], [0, 0, 1, 1], [], []>} : vector<8x32xf32>, vector<32x128xf32>, vector<8x128xf32> -> vector<8x128xf32>
    %269 = arith.addf %267, %268 : vector<8x128xf32>
    %cst_64 = arith.constant 5.000000e-01 : f32
    %270 = vector.broadcast %cst_64 : f32 to vector<8x128xf32>
    %271 = arith.mulf %270, %269 : vector<8x128xf32>
    %272 = arith.select %5, %269, %271 : vector<8x128xi1>, vector<8x128xf32>
    %273 = math.tanh %272 : vector<8x128xf32>
    %cst_65 = arith.constant 5.000000e-01 : f32
    %274 = vector.broadcast %cst_65 : f32 to vector<8x128xf32>
    %275 = arith.mulf %274, %273 : vector<8x128xf32>
    %cst_66 = arith.constant 5.000000e-01 : f32
    %276 = vector.broadcast %cst_66 : f32 to vector<8x128xf32>
    %277 = arith.addf %275, %276 : vector<8x128xf32>
    %278 = arith.select %5, %273, %277 : vector<8x128xi1>, vector<8x128xf32>
    %279 = vector.extract_strided_slice %278 {offsets = [0, 0], sizes = [8, 32], strides = [1, 1]} : vector<8x128xf32> to vector<8x32xf32>
    %280 = vector.extract_strided_slice %278 {offsets = [0, 32], sizes = [8, 32], strides = [1, 1]} : vector<8x128xf32> to vector<8x32xf32>
    %281 = vector.extract_strided_slice %278 {offsets = [0, 64], sizes = [8, 32], strides = [1, 1]} : vector<8x128xf32> to vector<8x32xf32>
    %282 = vector.extract_strided_slice %278 {offsets = [0, 96], sizes = [8, 32], strides = [1, 1]} : vector<8x128xf32> to vector<8x32xf32>
    %283 = arith.mulf %280, %264 : vector<8x32xf32>
    %284 = arith.mulf %279, %281 : vector<8x32xf32>
    %285 = arith.addf %283, %284 : vector<8x32xf32>
    %286 = math.tanh %285 : vector<8x32xf32>
    %287 = arith.mulf %282, %286 : vector<8x32xf32>
    %288 = vector.extract_strided_slice %222 {offsets = [24, 0], sizes = [8, 128], strides = [1, 1]} : vector<64x128xf32> to vector<8x128xf32>
    %cst_67 = arith.constant dense<0.000000e+00> : vector<8x128xf32>
    %289 = tpu.matmul %287, %216, %cst_67 {dimension_numbers = #tpu.dot_dimension_numbers<[1], [0], [0], [1], [0, 0, 1, 1], [], []>} : vector<8x32xf32>, vector<32x128xf32>, vector<8x128xf32> -> vector<8x128xf32>
    %290 = arith.addf %288, %289 : vector<8x128xf32>
    %cst_68 = arith.constant 5.000000e-01 : f32
    %291 = vector.broadcast %cst_68 : f32 to vector<8x128xf32>
    %292 = arith.mulf %291, %290 : vector<8x128xf32>
    %293 = arith.select %5, %290, %292 : vector<8x128xi1>, vector<8x128xf32>
    %294 = math.tanh %293 : vector<8x128xf32>
    %cst_69 = arith.constant 5.000000e-01 : f32
    %295 = vector.broadcast %cst_69 : f32 to vector<8x128xf32>
    %296 = arith.mulf %295, %294 : vector<8x128xf32>
    %cst_70 = arith.constant 5.000000e-01 : f32
    %297 = vector.broadcast %cst_70 : f32 to vector<8x128xf32>
    %298 = arith.addf %296, %297 : vector<8x128xf32>
    %299 = arith.select %5, %294, %298 : vector<8x128xi1>, vector<8x128xf32>
    %300 = vector.extract_strided_slice %299 {offsets = [0, 0], sizes = [8, 32], strides = [1, 1]} : vector<8x128xf32> to vector<8x32xf32>
    %301 = vector.extract_strided_slice %299 {offsets = [0, 32], sizes = [8, 32], strides = [1, 1]} : vector<8x128xf32> to vector<8x32xf32>
    %302 = vector.extract_strided_slice %299 {offsets = [0, 64], sizes = [8, 32], strides = [1, 1]} : vector<8x128xf32> to vector<8x32xf32>
    %303 = vector.extract_strided_slice %299 {offsets = [0, 96], sizes = [8, 32], strides = [1, 1]} : vector<8x128xf32> to vector<8x32xf32>
    %304 = arith.mulf %301, %285 : vector<8x32xf32>
    %305 = arith.mulf %300, %302 : vector<8x32xf32>
    %306 = arith.addf %304, %305 : vector<8x32xf32>
    %307 = math.tanh %306 : vector<8x32xf32>
    %308 = arith.mulf %303, %307 : vector<8x32xf32>
    %309 = vector.extract_strided_slice %222 {offsets = [32, 0], sizes = [8, 128], strides = [1, 1]} : vector<64x128xf32> to vector<8x128xf32>
    %cst_71 = arith.constant dense<0.000000e+00> : vector<8x128xf32>
    %310 = tpu.matmul %308, %216, %cst_71 {dimension_numbers = #tpu.dot_dimension_numbers<[1], [0], [0], [1], [0, 0, 1, 1], [], []>} : vector<8x32xf32>, vector<32x128xf32>, vector<8x128xf32> -> vector<8x128xf32>
    %311 = arith.addf %309, %310 : vector<8x128xf32>
    %cst_72 = arith.constant 5.000000e-01 : f32
    %312 = vector.broadcast %cst_72 : f32 to vector<8x128xf32>
    %313 = arith.mulf %312, %311 : vector<8x128xf32>
    %314 = arith.select %5, %311, %313 : vector<8x128xi1>, vector<8x128xf32>
    %315 = math.tanh %314 : vector<8x128xf32>
    %cst_73 = arith.constant 5.000000e-01 : f32
    %316 = vector.broadcast %cst_73 : f32 to vector<8x128xf32>
    %317 = arith.mulf %316, %315 : vector<8x128xf32>
    %cst_74 = arith.constant 5.000000e-01 : f32
    %318 = vector.broadcast %cst_74 : f32 to vector<8x128xf32>
    %319 = arith.addf %317, %318 : vector<8x128xf32>
    %320 = arith.select %5, %315, %319 : vector<8x128xi1>, vector<8x128xf32>
    %321 = vector.extract_strided_slice %320 {offsets = [0, 0], sizes = [8, 32], strides = [1, 1]} : vector<8x128xf32> to vector<8x32xf32>
    %322 = vector.extract_strided_slice %320 {offsets = [0, 32], sizes = [8, 32], strides = [1, 1]} : vector<8x128xf32> to vector<8x32xf32>
    %323 = vector.extract_strided_slice %320 {offsets = [0, 64], sizes = [8, 32], strides = [1, 1]} : vector<8x128xf32> to vector<8x32xf32>
    %324 = vector.extract_strided_slice %320 {offsets = [0, 96], sizes = [8, 32], strides = [1, 1]} : vector<8x128xf32> to vector<8x32xf32>
    %325 = arith.mulf %322, %306 : vector<8x32xf32>
    %326 = arith.mulf %321, %323 : vector<8x32xf32>
    %327 = arith.addf %325, %326 : vector<8x32xf32>
    %328 = math.tanh %327 : vector<8x32xf32>
    %329 = arith.mulf %324, %328 : vector<8x32xf32>
    %330 = vector.extract_strided_slice %222 {offsets = [40, 0], sizes = [8, 128], strides = [1, 1]} : vector<64x128xf32> to vector<8x128xf32>
    %cst_75 = arith.constant dense<0.000000e+00> : vector<8x128xf32>
    %331 = tpu.matmul %329, %216, %cst_75 {dimension_numbers = #tpu.dot_dimension_numbers<[1], [0], [0], [1], [0, 0, 1, 1], [], []>} : vector<8x32xf32>, vector<32x128xf32>, vector<8x128xf32> -> vector<8x128xf32>
    %332 = arith.addf %330, %331 : vector<8x128xf32>
    %cst_76 = arith.constant 5.000000e-01 : f32
    %333 = vector.broadcast %cst_76 : f32 to vector<8x128xf32>
    %334 = arith.mulf %333, %332 : vector<8x128xf32>
    %335 = arith.select %5, %332, %334 : vector<8x128xi1>, vector<8x128xf32>
    %336 = math.tanh %335 : vector<8x128xf32>
    %cst_77 = arith.constant 5.000000e-01 : f32
    %337 = vector.broadcast %cst_77 : f32 to vector<8x128xf32>
    %338 = arith.mulf %337, %336 : vector<8x128xf32>
    %cst_78 = arith.constant 5.000000e-01 : f32
    %339 = vector.broadcast %cst_78 : f32 to vector<8x128xf32>
    %340 = arith.addf %338, %339 : vector<8x128xf32>
    %341 = arith.select %5, %336, %340 : vector<8x128xi1>, vector<8x128xf32>
    %342 = vector.extract_strided_slice %341 {offsets = [0, 0], sizes = [8, 32], strides = [1, 1]} : vector<8x128xf32> to vector<8x32xf32>
    %343 = vector.extract_strided_slice %341 {offsets = [0, 32], sizes = [8, 32], strides = [1, 1]} : vector<8x128xf32> to vector<8x32xf32>
    %344 = vector.extract_strided_slice %341 {offsets = [0, 64], sizes = [8, 32], strides = [1, 1]} : vector<8x128xf32> to vector<8x32xf32>
    %345 = vector.extract_strided_slice %341 {offsets = [0, 96], sizes = [8, 32], strides = [1, 1]} : vector<8x128xf32> to vector<8x32xf32>
    %346 = arith.mulf %343, %327 : vector<8x32xf32>
    %347 = arith.mulf %342, %344 : vector<8x32xf32>
    %348 = arith.addf %346, %347 : vector<8x32xf32>
    %349 = math.tanh %348 : vector<8x32xf32>
    %350 = arith.mulf %345, %349 : vector<8x32xf32>
    %351 = vector.extract_strided_slice %222 {offsets = [48, 0], sizes = [8, 128], strides = [1, 1]} : vector<64x128xf32> to vector<8x128xf32>
    %cst_79 = arith.constant dense<0.000000e+00> : vector<8x128xf32>
    %352 = tpu.matmul %350, %216, %cst_79 {dimension_numbers = #tpu.dot_dimension_numbers<[1], [0], [0], [1], [0, 0, 1, 1], [], []>} : vector<8x32xf32>, vector<32x128xf32>, vector<8x128xf32> -> vector<8x128xf32>
    %353 = arith.addf %351, %352 : vector<8x128xf32>
    %cst_80 = arith.constant 5.000000e-01 : f32
    %354 = vector.broadcast %cst_80 : f32 to vector<8x128xf32>
    %355 = arith.mulf %354, %353 : vector<8x128xf32>
    %356 = arith.select %5, %353, %355 : vector<8x128xi1>, vector<8x128xf32>
    %357 = math.tanh %356 : vector<8x128xf32>
    %cst_81 = arith.constant 5.000000e-01 : f32
    %358 = vector.broadcast %cst_81 : f32 to vector<8x128xf32>
    %359 = arith.mulf %358, %357 : vector<8x128xf32>
    %cst_82 = arith.constant 5.000000e-01 : f32
    %360 = vector.broadcast %cst_82 : f32 to vector<8x128xf32>
    %361 = arith.addf %359, %360 : vector<8x128xf32>
    %362 = arith.select %5, %357, %361 : vector<8x128xi1>, vector<8x128xf32>
    %363 = vector.extract_strided_slice %362 {offsets = [0, 0], sizes = [8, 32], strides = [1, 1]} : vector<8x128xf32> to vector<8x32xf32>
    %364 = vector.extract_strided_slice %362 {offsets = [0, 32], sizes = [8, 32], strides = [1, 1]} : vector<8x128xf32> to vector<8x32xf32>
    %365 = vector.extract_strided_slice %362 {offsets = [0, 64], sizes = [8, 32], strides = [1, 1]} : vector<8x128xf32> to vector<8x32xf32>
    %366 = vector.extract_strided_slice %362 {offsets = [0, 96], sizes = [8, 32], strides = [1, 1]} : vector<8x128xf32> to vector<8x32xf32>
    %367 = arith.mulf %364, %348 : vector<8x32xf32>
    %368 = arith.mulf %363, %365 : vector<8x32xf32>
    %369 = arith.addf %367, %368 : vector<8x32xf32>
    %370 = math.tanh %369 : vector<8x32xf32>
    %371 = arith.mulf %366, %370 : vector<8x32xf32>
    %372 = vector.extract_strided_slice %222 {offsets = [56, 0], sizes = [8, 128], strides = [1, 1]} : vector<64x128xf32> to vector<8x128xf32>
    %cst_83 = arith.constant dense<0.000000e+00> : vector<8x128xf32>
    %373 = tpu.matmul %371, %216, %cst_83 {dimension_numbers = #tpu.dot_dimension_numbers<[1], [0], [0], [1], [0, 0, 1, 1], [], []>} : vector<8x32xf32>, vector<32x128xf32>, vector<8x128xf32> -> vector<8x128xf32>
    %374 = arith.addf %372, %373 : vector<8x128xf32>
    %cst_84 = arith.constant 5.000000e-01 : f32
    %375 = vector.broadcast %cst_84 : f32 to vector<8x128xf32>
    %376 = arith.mulf %375, %374 : vector<8x128xf32>
    %377 = arith.select %5, %374, %376 : vector<8x128xi1>, vector<8x128xf32>
    %378 = math.tanh %377 : vector<8x128xf32>
    %cst_85 = arith.constant 5.000000e-01 : f32
    %379 = vector.broadcast %cst_85 : f32 to vector<8x128xf32>
    %380 = arith.mulf %379, %378 : vector<8x128xf32>
    %cst_86 = arith.constant 5.000000e-01 : f32
    %381 = vector.broadcast %cst_86 : f32 to vector<8x128xf32>
    %382 = arith.addf %380, %381 : vector<8x128xf32>
    %383 = arith.select %5, %378, %382 : vector<8x128xi1>, vector<8x128xf32>
    %384 = vector.extract_strided_slice %383 {offsets = [0, 0], sizes = [8, 32], strides = [1, 1]} : vector<8x128xf32> to vector<8x32xf32>
    %385 = vector.extract_strided_slice %383 {offsets = [0, 32], sizes = [8, 32], strides = [1, 1]} : vector<8x128xf32> to vector<8x32xf32>
    %386 = vector.extract_strided_slice %383 {offsets = [0, 64], sizes = [8, 32], strides = [1, 1]} : vector<8x128xf32> to vector<8x32xf32>
    %387 = vector.extract_strided_slice %383 {offsets = [0, 96], sizes = [8, 32], strides = [1, 1]} : vector<8x128xf32> to vector<8x32xf32>
    %388 = arith.mulf %385, %369 : vector<8x32xf32>
    %389 = arith.mulf %384, %386 : vector<8x32xf32>
    %390 = arith.addf %388, %389 : vector<8x32xf32>
    %391 = math.tanh %390 : vector<8x32xf32>
    %392 = arith.mulf %387, %391 : vector<8x32xf32>
    %393 = tpu.concatenate %245, %266, %287, %308, %329, %350, %371, %392 in 0 : vector<8x32xf32>, vector<8x32xf32>, vector<8x32xf32>, vector<8x32xf32>, vector<8x32xf32>, vector<8x32xf32>, vector<8x32xf32>, vector<8x32xf32> -> vector<64x32xf32>
    %394 = vector.broadcast %11 : vector<64x1xf32> to vector<64x32xf32>
    %395 = arith.mulf %393, %394 : vector<64x32xf32>
    %cst_87 = arith.constant dense<0.000000e+00> : vector<32xf32>
    %396 = vector.multi_reduction <add>, %395, %cst_87 [0] : vector<64x32xf32> to vector<32xf32>
    %397 = vector.shape_cast %396 : vector<32xf32> to vector<1x32xf32>
    %cst_88 = arith.constant 3.125000e-02 : f32
    %398 = vector.broadcast %cst_88 : f32 to vector<1x32xf32>
    %399 = arith.mulf %397, %398 : vector<1x32xf32>
    %400 = vector.broadcast %399 : vector<1x32xf32> to vector<64x32xf32>
    %401 = arith.subf %393, %400 : vector<64x32xf32>
    %402 = arith.mulf %401, %401 : vector<64x32xf32>
    %403 = vector.broadcast %11 : vector<64x1xf32> to vector<64x32xf32>
    %404 = arith.mulf %402, %403 : vector<64x32xf32>
    %cst_89 = arith.constant dense<0.000000e+00> : vector<32xf32>
    %405 = vector.multi_reduction <add>, %404, %cst_89 [0] : vector<64x32xf32> to vector<32xf32>
    %406 = vector.shape_cast %405 : vector<32xf32> to vector<1x32xf32>
    %cst_90 = arith.constant 3.125000e-02 : f32
    %407 = vector.broadcast %cst_90 : f32 to vector<1x32xf32>
    %408 = arith.mulf %406, %407 : vector<1x32xf32>
    %cst_91 = arith.constant 9.99999974E-6 : f32
    %409 = vector.broadcast %cst_91 : f32 to vector<1x32xf32>
    %410 = arith.addf %408, %409 : vector<1x32xf32>
    %411 = math.rsqrt %410 : vector<1x32xf32>
    %412 = arith.mulf %218, %411 : vector<1x32xf32>
    %413 = vector.broadcast %412 : vector<1x32xf32> to vector<64x32xf32>
    %414 = arith.mulf %401, %413 : vector<64x32xf32>
    %415 = vector.broadcast %219 : vector<1x32xf32> to vector<64x32xf32>
    %416 = arith.addf %414, %415 : vector<64x32xf32>
    %c6 = arith.constant 6 : index
    %c0_92 = arith.constant 0 : index
    %417 = vector.load %arg2[%c6, %c0_92] : memref<8x128xf32, #tpu.memory_space<vmem>>, vector<1x32xf32>
    %c7 = arith.constant 7 : index
    %c0_93 = arith.constant 0 : index
    %418 = vector.load %arg2[%c7, %c0_93] : memref<8x128xf32, #tpu.memory_space<vmem>>, vector<1x1xf32>
    %419 = vector.extract_strided_slice %416 {offsets = [56, 0], sizes = [8, 32], strides = [1, 1]} : vector<64x32xf32> to vector<8x32xf32>
    %420 = vector.broadcast %417 : vector<1x32xf32> to vector<8x32xf32>
    %421 = arith.mulf %419, %420 : vector<8x32xf32>
    %cst_94 = arith.constant dense<0.000000e+00> : vector<8xf32>
    %422 = vector.multi_reduction <add>, %421, %cst_94 [1] : vector<8x32xf32> to vector<8xf32>
    %423 = vector.shape_cast %422 : vector<8xf32> to vector<8x1xf32>
    %424 = vector.broadcast %418 : vector<1x1xf32> to vector<8x1xf32>
    %425 = arith.addf %423, %424 : vector<8x1xf32>
    %426 = vector.extract_strided_slice %425 {offsets = [0, 0], sizes = [4, 1], strides = [1, 1]} : vector<8x1xf32> to vector<4x1xf32>
    %c0_95 = arith.constant 0 : index
    %c0_96 = arith.constant 0 : index
    %427 = vector.load %arg3[%c0_95, %c0_96] : memref<4x1xf32, #tpu.memory_space<vmem>>, vector<4x1xf32>
    tpu.vector_store %arg3[%c0_95, %c0_96], %426 {strides = array<i32>} : memref<4x1xf32, #tpu.memory_space<vmem>>, vector<4x1xf32>,
    return
  }
}

</mosaic_0001>

<bundles_post_ra>
// kernel: _forward_impl.1
= control target key start
LH: loop header
LB: loop body
LE: loop exit
PB: predicated region body
PF: predicated region fallthrough
CT: control target
= control target key end

     0   :  { %vm41_vm0 = vcmask 64512   ;;  %v1340_v6 = vmov 0.0   ;;  %v14_v7 = vlaneseq  ;;  %s1341_s26 = smov 64   ;;  %s1342_s27 = smov 32   ;;  %vm107_vm4 = vcmask 261120   ;;  %s1933_s1 = inlined_call_operand.vmem [shape: f32[104,128], index: 1, kind: input, shape index: {}]   ;;  %s1934_s0 = inlined_call_operand.vmem [shape: f32[64,8], index: 0, kind: input, shape index: {}]   ;;  %s1935_s2 = inlined_call_operand.vmem [shape: f32[8,128], index: 2, kind: input, shape index: {}]   ;;  %s1936_s3 = inlined_call_operand.vmem [shape: f32[4,1], index: 3, kind: output, shape index: {}]  }
   0x1   :  { %v1368_v0 = vld [vmem:[%s1933_s1 + $0x20] sm:$0xff]  ;;  %v1373_v1 = vld [vmem:[%s1933_s1 + $0x18] sm:$0xff]  ;;  %v1385_v4 = vld [vmem:[%s1933_s1 + $0x10] sm:$0xff]  ;;  %vm511_vm6 = vcmask 1048320   ;;  %s1344_s16 = smov 96   ;;  %vm1223_vm13 = vcmask 3072  }
   0x2   :  { %v32_v2 = vld [vmem:[%s1933_s1] sm:$0xff]  ;;  %123 = vmatpush.msra.mxu1 %v1368_v0  ;;  %172 = vmatpush.msra.mxu2 %v1368_v0  ;;  %v1393_v5 = vld [vmem:[%s1933_s1 + $0x8] sm:$0xff]  ;;  %v15_v10 = vand.u32 127, %v14_v7  ;;  %v26_v47 = vld [vmem:[%s1934_s0 + $0x10] sm:$0xff] }
   0x3   :  { %81 = vmatpush.msra.mxu0 %v32_v2  ;;  %v24_v3 = vld [vmem:[%s1934_s0] sm:$0xff]  ;;  %v25_v29 = vld [vmem:[%s1934_s0 + $0x8] sm:$0xff] }
   0x4   :  { %1230 = vmatmul.msk.f32.vlgmr.msra.gmra.mxu0 %vm41_vm0, %v24_v3  ;;  %124 = vmatpush.msra.mxu1 %v1373_v1  ;;  %v1416_v8 = vld [vmem:[%s1935_s2] ss:$0 sm:$0xff]  ;;  %vm16_vm1 = vcmp.ge.s32.totalorder %v15_v10, 64  ;;  %vm17_vm2 = vcmp.lt.s32.totalorder %v15_v10, 96  ;;  %v27_v10 = vld [vmem:[%s1934_s0 + $0x18] sm:$0xff] }
   0x5   :  { %173 = vmatpush.msra.mxu2 %v1373_v1  ;;  %vm1420_vm3 = vmand %vm16_vm1, %vm17_vm2 }
   0x6   :  { %125 = vmatpush.msra.mxu1 %v1385_v4 }
   0x7   :  { %174 = vmatpush.msra.mxu2 %v1385_v4 }
   0x8   :  { %126 = vmatpush.msra.mxu1 %v1393_v5 }
   0x9   :  { %127 = vmatmul.f32.vlgmr.msra.gmra.mxu1 %v1340_v6  ;;  %175 = vmatpush.msra.mxu2 %v1393_v5 }
   0xa   :  { %221 = vmatpush.msrb.mxu1 %v1368_v0 }
   0xb   :  { %319 = vmatpush.msrb.mxu2 %v1368_v0 }
   0xc   :  { %222 = vmatpush.msrb.mxu1 %v1373_v1  ;;  %1231 = vmatmul.msk.f32.gmra.mxu0 %vm41_vm0, %v25_v29 }
   0xd   :  { %320 = vmatpush.msrb.mxu2 %v1373_v1 }
   0xe   :  { %223 = vmatpush.msrb.mxu1 %v1385_v4 }
   0xf   :  { %321 = vmatpush.msrb.mxu2 %v1385_v4 }
  0x10   :  { %224 = vmatpush.msrb.mxu1 %v1393_v5 }
  0x11   :  { %322 = vmatpush.msrb.mxu2 %v1393_v5 }
  0x12   :  { %270 = vmatpush.msra.mxu1 %v1368_v0 }
  0x14   :  { %271 = vmatpush.msra.mxu1 %v1373_v1  ;;  %1232 = vmatmul.msk.f32.gmra.mxu0 %vm41_vm0, %v26_v47 }
  0x16   :  { %272 = vmatpush.msra.mxu1 %v1385_v4 }
  0x18   :  { %273 = vmatpush.msra.mxu1 %v1393_v5 }
  0x1c   :  { %1233 = vmatmul.msk.f32.gmra.mxu0 %vm41_vm0, %v27_v10 }
  0x81   :  { %v83_v9 = vpop.f32.mrf.mxu0 }
  0x82   :  { %v84_v11 = vadd.f32 %v1416_v8, %v83_v9 }
  0x86   :  { %v128_v12 = vpop.f32.mrf.mxu1 }
  0x87   :  { %v131_v13 = vadd.f32 %v128_v12, %v84_v11 }
  0x89   :  { %v132_v15 = vmul.f32 0.5, %v131_v13  ;;  %v86_v31 = vpop.f32.mrf.mxu0 }
  0x8a   :  { %v87_v32 = vadd.f32 %v1416_v8, %v86_v31 }
  0x8b   :  { %v133_v16 = vsel %vm1420_vm3, %v131_v13, %v132_v15 }
  0x8c   :  { %1272 = vtanh.f32 %v133_v16 }
  0x91   :  { %v89_v51 = vpop.f32.mrf.mxu0 }
  0x92   :  { %v1273_v17 = vpop.eup %1272  ;;  %v90_v52 = vadd.f32 %v1416_v8, %v89_v51  ;;  %v29_v51 = vld [vmem:[%s1934_s0 + $0x28] sm:$0xff] }
  0x93   :  { %v135_v18 = vmul.f32 0.5, %v1273_v17 }
  0x95   :  { %v136_v19 = vadd.f32 0.5, %v135_v18 }
  0x97   :  { %v137_v20 = vsel %vm1420_vm3, %v1273_v17, %v136_v19 }
  0x98   :  { %140 = vrot.lane.b32.xlu0 %v137_v20, %s1341_s26  ;;  %v138_v23 = vmul.f32 0.0, %v137_v20 }
  0x99   :  { %v92_v15 = vpop.f32.mrf.mxu0 }
  0x9a   :  { %v93_v16 = vadd.f32 %v1416_v8, %v92_v15 }
 0x10a   :  { %v141_v21 = vpop.permute.xlu0 %140 }
 0x10b   :  { %v143_v22 = vmul.f32 %v141_v21, %v137_v20 }
 0x10d   :  { %145 = vrot.lane.b32.xlu0 %v143_v22, %s1342_s27 }
 0x17f   :  { %v146_v24 = vpop.permute.xlu0 %145 }
 0x180   :  { %v148_v25 = vadd.f32 %v146_v24, %v138_v23 }
 0x182   :  { %1274 = vtanh.f32 %v148_v25 }
 0x188   :  { %v1275_v26 = vpop.eup %1274 }
 0x189   :  { %151 = vrot.lane.b32.xlu1 %v1275_v26, %s1341_s26 }
 0x1fb   :  { %v152_v27 = vpop.permute.xlu1 %151 }
 0x1fc   :  { %v1431_v28 = vmul.f32 %v152_v27, %v137_v20 }
 0x1fe   :  { %156 = vrot.lane.b32.xlu1 %v1431_v28, %s1342_s27 }
 0x270   :  { %v157_v30 = vpop.permute.xlu1 %156 }
 0x271   :  { %1238 = vmatmul.msk.f32.vlgmr.msra.gmra.mxu2 %vm107_vm4, %v157_v30 }
 0x272   :  { %368 = vmatpush.msra.mxu2 %v1368_v0 }
 0x274   :  { %369 = vmatpush.msra.mxu2 %v1373_v1 }
 0x276   :  { %370 = vmatpush.msra.mxu2 %v1385_v4 }
 0x278   :  { %371 = vmatpush.msra.mxu2 %v1393_v5 }
 0x2f4   :  { %v177_v33 = vpop.f32.mrf.mxu2 }
 0x2f5   :  { %v180_v34 = vadd.f32 %v177_v33, %v87_v32 }
 0x2f7   :  { %v181_v35 = vmul.f32 0.5, %v180_v34 }
 0x2f9   :  { %v182_v36 = vsel %vm1420_vm3, %v180_v34, %v181_v35  ;;  %v28_v34 = vld [vmem:[%s1934_s0 + $0x20] sm:$0xff] }
 0x2fa   :  { %1276 = vtanh.f32 %v182_v36  ;;  %1234 = vmatmul.msk.f32.gmra.mxu0 %vm41_vm0, %v28_v34 }
 0x300   :  { %v1277_v37 = vpop.eup %1276 }
 0x301   :  { %v184_v38 = vmul.f32 0.5, %v1277_v37 }
 0x302   :  { %1235 = vmatmul.msk.f32.gmra.mxu0 %vm41_vm0, %v29_v51 }
 0x303   :  { %v185_v39 = vadd.f32 0.5, %v184_v38 }
 0x305   :  { %v186_v40 = vsel %vm1420_vm3, %v1277_v37, %v185_v39 }
 0x306   :  { %189 = vrot.lane.b32.xlu2 %v186_v40, %s1341_s26  ;;  %v187_v43 = vmul.f32 %v186_v40, %v148_v25 }
 0x360   :  { %v190_v41 = vpop.permute.xlu2 %189 }
 0x361   :  { %v192_v42 = vmul.f32 %v190_v41, %v186_v40 }
 0x363   :  { %194 = vrot.lane.b32.xlu2 %v192_v42, %s1342_s27 }
 0x377   :  { %v95_v36 = vpop.f32.mrf.mxu0 }
 0x378   :  { %v96_v37 = vadd.f32 %v1416_v8, %v95_v36  ;;  %v1343_v36 = vmov 0  }
 0x379   :  { %1265 = vset.pattern.permute.xlu0 %v1343_v36 }
 0x3bd   :  { %v195_v44 = vpop.permute.xlu2 %194 }
 0x3be   :  { %v197_v45 = vadd.f32 %v195_v44, %v187_v43 }
 0x3c0   :  { %1278 = vtanh.f32 %v197_v45 }
 0x3c6   :  { %v1279_v46 = vpop.eup %1278 }
 0x3c7   :  { %200 = vrot.lane.b32.xlu0 %v1279_v46, %s1341_s26 }
 0x439   :  { %v201_v48 = vpop.permute.xlu0 %200 }
 0x43a   :  { %v1456_v49 = vmul.f32 %v201_v48, %v186_v40 }
 0x43c   :  { %205 = vrot.lane.b32.xlu1 %v1456_v49, %s1342_s27 }
 0x4ae   :  { %v206_v50 = vpop.permute.xlu1 %205 }
 0x4af   :  { %1239 = vmatmul.msk.f32.vlgmr.msrb.gmra.mxu1 %vm107_vm4, %v206_v50 }
 0x4b0   :  { %417 = vmatpush.msrb.mxu1 %v1368_v0 }
 0x4b2   :  { %418 = vmatpush.msrb.mxu1 %v1373_v1 }
 0x4b4   :  { %419 = vmatpush.msrb.mxu1 %v1385_v4 }
 0x4b6   :  { %420 = vmatpush.msrb.mxu1 %v1393_v5 }
 0x52c   :  { %v226_v53 = vpop.f32.mrf.mxu1 }
 0x52d   :  { %v229_v54 = vadd.f32 %v226_v53, %v90_v52  ;;  %v98_v53 = vpop.f32.mrf.mxu0 }
 0x52f   :  { %v230_v55 = vmul.f32 0.5, %v229_v54 }
 0x531   :  { %v231_v56 = vsel %vm1420_vm3, %v229_v54, %v230_v55  ;;  %v99_v54 = vadd.f32 %v1416_v8, %v98_v53 }
 0x532   :  { %1280 = vtanh.f32 %v231_v56 }
 0x538   :  { %v1281_v57 = vpop.eup %1280 }
 0x539   :  { %v233_v58 = vmul.f32 0.5, %v1281_v57 }
 0x53b   :  { %v234_v59 = vadd.f32 0.5, %v233_v58 }
 0x53d   :  { %v235_v60 = vsel %vm1420_vm3, %v1281_v57, %v234_v59 }
 0x53e   :  { %238 = vrot.lane.b32.xlu2 %v235_v60, %s1341_s26  ;;  %v236_v63 = vmul.f32 %v235_v60, %v197_v45 }
 0x598   :  { %v239_v61 = vpop.permute.xlu2 %238 }
 0x599   :  { %v241_v62 = vmul.f32 %v239_v61, %v235_v60 }
 0x59b   :  { %243 = vrot.lane.b32.xlu0 %v241_v62, %s1342_s27 }
 0x60d   :  { %v244_v2 = vpop.permute.xlu0 %243 }
 0x60e   :  { %v246_v3 = vadd.f32 %v244_v2, %v236_v63 }
 0x610   :  { %1282 = vtanh.f32 %v246_v3 }
 0x616   :  { %v1283_v9 = vpop.eup %1282 }
 0x617   :  { %249 = vrot.lane.b32.xlu1 %v1283_v9, %s1341_s26 }
 0x689   :  { %v250_v11 = vpop.permute.xlu1 %249 }
 0x68a   :  { %v1477_v12 = vmul.f32 %v250_v11, %v235_v60 }
 0x68c   :  { %254 = vrot.lane.b32.xlu2 %v1477_v12, %s1342_s27 }
 0x6e6   :  { %v255_v13 = vpop.permute.xlu2 %254 }
 0x6e7   :  { %1240 = vmatmul.msk.f32.vlgmr.msra.gmra.mxu1 %vm107_vm4, %v255_v13  ;;  %v30_v13 = vld [vmem:[%s1934_s0 + $0x30] sm:$0xff] }
 0x6e8   :  { %1236 = vmatmul.msk.f32.gmra.mxu0 %vm41_vm0, %v30_v13 }
 0x764   :  { %v275_v17 = vpop.f32.mrf.mxu1 }
 0x765   :  { %v278_v18 = vadd.f32 %v275_v17, %v93_v16 }
 0x767   :  { %v279_v19 = vmul.f32 0.5, %v278_v18 }
 0x769   :  { %v280_v20 = vsel %vm1420_vm3, %v278_v18, %v279_v19  ;;  %v101_v18 = vpop.f32.mrf.mxu0 }
 0x76a   :  { %1284 = vtanh.f32 %v280_v20  ;;  %v102_v19 = vadd.f32 %v1416_v8, %v101_v18 }
 0x770   :  { %v1285_v21 = vpop.eup %1284 }
 0x771   :  { %v282_v22 = vmul.f32 0.5, %v1285_v21 }
 0x773   :  { %v283_v23 = vadd.f32 0.5, %v282_v22 }
 0x775   :  { %v284_v24 = vsel %vm1420_vm3, %v1285_v21, %v283_v23 }
 0x776   :  { %287 = vrot.lane.b32.xlu0 %v284_v24, %s1341_s26  ;;  %v285_v27 = vmul.f32 %v284_v24, %v246_v3 }
 0x7e8   :  { %v288_v25 = vpop.permute.xlu0 %287 }
 0x7e9   :  { %v290_v26 = vmul.f32 %v288_v25, %v284_v24 }
 0x7eb   :  { %292 = vrot.lane.b32.xlu1 %v290_v26, %s1342_s27 }
 0x85d   :  { %v293_v29 = vpop.permute.xlu1 %292 }
 0x85e   :  { %v295_v30 = vadd.f32 %v293_v29, %v285_v27 }
 0x860   :  { %1286 = vtanh.f32 %v295_v30 }
 0x866   :  { %v1287_v31 = vpop.eup %1286 }
 0x867   :  { %298 = vrot.lane.b32.xlu2 %v1287_v31, %s1341_s26 }
 0x8c1   :  { %v299_v32 = vpop.permute.xlu2 %298 }
 0x8c2   :  { %v1490_v33 = vmul.f32 %v299_v32, %v284_v24 }
 0x8c4   :  { %303 = vrot.lane.b32.xlu0 %v1490_v33, %s1342_s27 }
 0x936   :  { %v304_v35 = vpop.permute.xlu0 %303 }
 0x937   :  { %1241 = vmatmul.msk.f32.vlgmr.msrb.gmra.mxu2 %vm107_vm4, %v304_v35 }
 0x938   :  { %466 = vmatpush.msrb.mxu2 %v1368_v0 }
 0x93a   :  { %467 = vmatpush.msrb.mxu2 %v1373_v1 }
 0x93c   :  { %468 = vmatpush.msrb.mxu2 %v1385_v4 }
 0x93e   :  { %469 = vmatpush.msrb.mxu2 %v1393_v5 }
 0x9ba   :  { %v324_v38 = vpop.f32.mrf.mxu2 }
 0x9bb   :  { %v327_v39 = vadd.f32 %v324_v38, %v96_v37 }
 0x9bd   :  { %v328_v40 = vmul.f32 0.5, %v327_v39 }
 0x9bf   :  { %v329_v41 = vsel %vm1420_vm3, %v327_v39, %v328_v40  ;;  %v20_v39 = vshrl.u32 %v14_v7, 7 }
 0x9c0   :  { %1288 = vtanh.f32 %v329_v41  ;;  %v31_v41 = vld [vmem:[%s1934_s0 + $0x38] sm:$0xff] }
 0x9c1   :  { %vm21_vm5 = vcmp.lt.s32.totalorder %v20_v39, 4  ;;  %1237 = vmatmul.msk.f32.gmra.mxu0 %vm41_vm0, %v31_v41 }
 0x9c2   :  { %v1229_v40 = vsel %vm21_vm5, 1.0, %v1340_v6 }
 0x9c6   :  { %v1289_v42 = vpop.eup %1288 }
 0x9c7   :  { %v331_v43 = vmul.f32 0.5, %v1289_v42 }
 0x9c9   :  { %v332_v44 = vadd.f32 0.5, %v331_v43 }
 0x9cb   :  { %v333_v0 = vsel %vm1420_vm3, %v1289_v42, %v332_v44 }
 0x9cc   :  { %336 = vrot.lane.b32.xlu1 %v333_v0, %s1341_s26  ;;  %v334_v5 = vmul.f32 %v333_v0, %v295_v30 }
 0xa3e   :  { %v337_v1 = vpop.permute.xlu1 %336  ;;  %v104_v43 = vpop.f32.mrf.mxu0 }
 0xa3f   :  { %v339_v4 = vmul.f32 %v337_v1, %v333_v0  ;;  %v105_v44 = vadd.f32 %v1416_v8, %v104_v43 }
 0xa41   :  { %341 = vrot.lane.b32.xlu2 %v339_v4, %s1342_s27 }
 0xa9b   :  { %v342_v45 = vpop.permute.xlu2 %341 }
 0xa9c   :  { %v344_v46 = vadd.f32 %v342_v45, %v334_v5 }
 0xa9e   :  { %1290 = vtanh.f32 %v344_v46 }
 0xaa4   :  { %v1291_v47 = vpop.eup %1290 }
 0xaa5   :  { %347 = vrot.lane.b32.xlu0 %v1291_v47, %s1341_s26 }
 0xb17   :  { %v348_v48 = vpop.permute.xlu0 %347 }
 0xb18   :  { %v1511_v50 = vmul.f32 %v348_v48, %v333_v0 }
 0xb1a   :  { %352 = vrot.lane.b32.xlu1 %v1511_v50, %s1342_s27 }
 0xb8c   :  { %v353_v52 = vpop.permute.xlu1 %352 }
 0xb8d   :  { %1242 = vmatmul.msk.f32.vlgmr.msra.gmra.mxu2 %vm107_vm4, %v353_v52 }
 0xc10   :  { %v373_v55 = vpop.f32.mrf.mxu2 }
 0xc11   :  { %v376_v56 = vadd.f32 %v373_v55, %v99_v54 }
 0xc13   :  { %v377_v57 = vmul.f32 0.5, %v376_v56 }
 0xc15   :  { %v378_v58 = vsel %vm1420_vm3, %v376_v56, %v377_v57 }
 0xc16   :  { %1292 = vtanh.f32 %v378_v58 }
 0xc1c   :  { %v1293_v59 = vpop.eup %1292 }
 0xc1d   :  { %v380_v60 = vmul.f32 0.5, %v1293_v59 }
 0xc1f   :  { %v381_v61 = vadd.f32 0.5, %v380_v60 }
 0xc21   :  { %v382_v62 = vsel %vm1420_vm3, %v1293_v59, %v381_v61 }
 0xc22   :  { %385 = vrot.lane.b32.xlu2 %v382_v62, %s1341_s26  ;;  %v383_v3 = vmul.f32 %v382_v62, %v344_v46 }
 0xc7c   :  { %v386_v63 = vpop.permute.xlu2 %385 }
 0xc7d   :  { %v388_v2 = vmul.f32 %v386_v63, %v382_v62 }
 0xc7f   :  { %390 = vrot.lane.b32.xlu0 %v388_v2, %s1342_s27 }
 0xcf1   :  { %v391_v9 = vpop.permute.xlu0 %390 }
 0xcf2   :  { %v393_v10 = vadd.f32 %v391_v9, %v383_v3 }
 0xcf4   :  { %1294 = vtanh.f32 %v393_v10 }
 0xcfa   :  { %v1295_v11 = vpop.eup %1294 }
 0xcfb   :  { %396 = vrot.lane.b32.xlu1 %v1295_v11, %s1341_s26 }
 0xd6d   :  { %v397_v15 = vpop.permute.xlu1 %396 }
 0xd6e   :  { %v1532_v16 = vmul.f32 %v397_v15, %v382_v62 }
 0xd70   :  { %401 = vrot.lane.b32.xlu2 %v1532_v16, %s1342_s27 }
 0xdca   :  { %v402_v17 = vpop.permute.xlu2 %401 }
 0xdcb   :  { %1243 = vmatmul.msk.f32.vlgmr.msrb.gmra.mxu1 %vm107_vm4, %v402_v17 }
 0xe48   :  { %v422_v20 = vpop.f32.mrf.mxu1 }
 0xe49   :  { %v425_v21 = vadd.f32 %v422_v20, %v102_v19 }
 0xe4b   :  { %v426_v22 = vmul.f32 0.5, %v425_v21 }
 0xe4d   :  { %v427_v23 = vsel %vm1420_vm3, %v425_v21, %v426_v22 }
 0xe4e   :  { %1296 = vtanh.f32 %v427_v23 }
 0xe54   :  { %v1297_v24 = vpop.eup %1296 }
 0xe55   :  { %v429_v25 = vmul.f32 0.5, %v1297_v24 }
 0xe57   :  { %v430_v26 = vadd.f32 0.5, %v429_v25 }
 0xe59   :  { %v431_v27 = vsel %vm1420_vm3, %v1297_v24, %v430_v26 }
 0xe5a   :  { %434 = vrot.lane.b32.xlu0 %v431_v27, %s1341_s26  ;;  %v432_v31 = vmul.f32 %v431_v27, %v393_v10 }
 0xecc   :  { %v435_v29 = vpop.permute.xlu0 %434 }
 0xecd   :  { %v437_v30 = vmul.f32 %v435_v29, %v431_v27 }
 0xecf   :  { %439 = vrot.lane.b32.xlu1 %v437_v30, %s1342_s27 }
 0xf41   :  { %v440_v32 = vpop.permute.xlu1 %439 }
 0xf42   :  { %v442_v34 = vadd.f32 %v440_v32, %v432_v31 }
 0xf44   :  { %1298 = vtanh.f32 %v442_v34 }
 0xf4a   :  { %v1299_v35 = vpop.eup %1298 }
 0xf4b   :  { %445 = vrot.lane.b32.xlu2 %v1299_v35, %s1341_s26 }
 0xfa5   :  { %v446_v37 = vpop.permute.xlu2 %445 }
 0xfa6   :  { %v1545_v38 = vmul.f32 %v446_v37, %v431_v27 }
 0xfa8   :  { %450 = vrot.lane.b32.xlu0 %v1545_v38, %s1342_s27 }
 0xfb0   :  { %500 = vperm.xlu0 %1265, %v1229_v40  }
0x101a   :  { %v451_v42 = vpop.permute.xlu0 %450 }
0x101b   :  { %1244 = vmatmul.msk.f32.vlgmr.msrb.gmra.mxu2 %vm107_vm4, %v451_v42 }
0x1022   :  { %v1564_v55 = vpop.permute.xlu0 %500 }
0x1023   :  { %v503_v56 = vmul.f32 %v1564_v55, %v1431_v28  ;;  %v504_v57 = vmul.f32 %v1564_v55, %v1456_v49  ;;  %v505_v60 = vmul.f32 %v1564_v55, %v1477_v12  ;;  %v506_v62 = vmul.f32 %v1564_v55, %v1490_v33 }
0x1024   :  { %v507_v3 = vmul.f32 %v1564_v55, %v1511_v50  ;;  %v508_v11 = vmul.f32 %v1564_v55, %v1532_v16  ;;  %v509_v17 = vmul.f32 %v1564_v55, %v1545_v38 }
0x1025   :  { %v512_v58 = vsel %vm511_vm6, %v503_v56, 0.0  ;;  %v513_v59 = vsel %vm511_vm6, %v504_v57, 0.0  ;;  %v515_v63 = vsel %vm511_vm6, %v505_v60, 0.0  ;;  %v517_v9 = vsel %vm511_vm6, %v506_v62, 0.0 }
0x1026   :  { %v514_v61 = vadd.f32 %v513_v59, %v512_v58  ;;  %v519_v13 = vsel %vm511_vm6, %v507_v3, 0.0  ;;  %v521_v18 = vsel %vm511_vm6, %v508_v11, 0.0  ;;  %v523_v23 = vsel %vm511_vm6, %v509_v17, 0.0 }
0x1028   :  { %v516_v2 = vadd.f32 %v515_v63, %v514_v61 }
0x102a   :  { %v518_v10 = vadd.f32 %v517_v9, %v516_v2 }
0x102c   :  { %v520_v15 = vadd.f32 %v519_v13, %v518_v10 }
0x102e   :  { %v522_v20 = vadd.f32 %v521_v18, %v520_v15 }
0x1030   :  { %v524_v24 = vadd.f32 %v523_v23, %v522_v20 }
0x109e   :  { %v471_v7 = vpop.f32.mrf.mxu2 }
0x109f   :  { %v474_v0 = vadd.f32 %v471_v7, %v105_v44 }
0x10a1   :  { %v475_v1 = vmul.f32 0.5, %v474_v0 }
0x10a3   :  { %v476_v4 = vsel %vm1420_vm3, %v474_v0, %v475_v1 }
0x10a4   :  { %1300 = vtanh.f32 %v476_v4 }
0x10aa   :  { %v1301_v5 = vpop.eup %1300 }
0x10ab   :  { %v478_v45 = vmul.f32 0.5, %v1301_v5 }
0x10ad   :  { %v479_v46 = vadd.f32 0.5, %v478_v45 }
0x10af   :  { %v480_v47 = vsel %vm1420_vm3, %v1301_v5, %v479_v46 }
0x10b0   :  { %483 = vrot.lane.b32.xlu1 %v480_v47, %s1341_s26  ;;  %v481_v8 = vmul.f32 %v480_v47, %v442_v34 }
0x1122   :  { %v484_v48 = vpop.permute.xlu1 %483 }
0x1123   :  { %v486_v51 = vmul.f32 %v484_v48, %v480_v47 }
0x1125   :  { %488 = vrot.lane.b32.xlu2 %v486_v51, %s1342_s27 }
0x117f   :  { %v489_v52 = vpop.permute.xlu2 %488 }
0x1180   :  { %v491_v53 = vadd.f32 %v489_v52, %v481_v8 }
0x1182   :  { %1302 = vtanh.f32 %v491_v53 }
0x1188   :  { %v1303_v54 = vpop.eup %1302 }
0x1189   :  { %494 = vrot.lane.b32.xlu1 %v1303_v54, %s1341_s26 }
0x11fb   :  { %v495_v19 = vpop.permute.xlu1 %494 }
0x11fc   :  { %v497_v21 = vmul.f32 %v495_v19, %v480_v47 }
0x11fe   :  { %v510_v22 = vmul.f32 %v1564_v55, %v497_v21 }
0x1200   :  { %v525_v25 = vsel %vm511_vm6, %v510_v22, 0.0 }
0x1201   :  { %v526_v26 = vadd.f32 %v525_v25, %v524_v24 }
0x1203   :  { %v527_v27 = vrot.slane %v526_v26, 4 }
0x1205   :  { %v528_v29 = vadd.f32 %v527_v27, %v526_v26  ;;  %v1267_v27 = vld [vmem:[%s1935_s2 + $0x2] ss:$0 sm:$0xff] }
0x1207   :  { %v529_v30 = vrot.slane %v528_v29, 2 }
0x1209   :  { %v530_v31 = vadd.f32 %v529_v30, %v528_v29  ;;  %v38_v29 = vld [vmem:[%s1935_s2 + $0x1] sm:$0x1] }
0x120b   :  { %v531_v32 = vrot.slane %v530_v31, 1 }
0x120d   :  { %v532_v34 = vadd.f32 %v531_v32, %v530_v31 }
0x120f   :  { %v533_v35 = vmul.f32 0.03125, %v532_v34  ;;  %v625_v34 = vld [vmem:[%s1933_s1 + $0x40] sm:$0xff] }
0x1210   :  { %686 = vmatpush.msra.mxu3 %v625_v34 }
0x1211   :  { %v1590_v36 = vsub.f32 %v1431_v28, %v533_v35  ;;  %v1593_v37 = vsub.f32 %v1456_v49, %v533_v35  ;;  %v1596_v39 = vsub.f32 %v1477_v12, %v533_v35  ;;  %v1599_v40 = vsub.f32 %v1490_v33, %v533_v35 }
0x1212   :  { %v1602_v41 = vsub.f32 %v1511_v50, %v533_v35  ;;  %v1605_v42 = vsub.f32 %v1532_v16, %v533_v35  ;;  %v1616_v33 = vsub.f32 %v1545_v38, %v533_v35  ;;  %v1623_v0 = vsub.f32 %v497_v21, %v533_v35  ;;  %v624_v35 = vld [vmem:[%s1933_s1 + $0x38] sm:$0xff] }
0x1213   :  { %v542_v43 = vmul.f32 %v1590_v36, %v1590_v36  ;;  %v543_v28 = vmul.f32 %v1593_v37, %v1593_v37  ;;  %v544_v49 = vmul.f32 %v1596_v39, %v1596_v39  ;;  %v545_v12 = vmul.f32 %v1599_v40, %v1599_v40  ;;  %687 = vmatpush.msra.mxu3 %v624_v35 }
0x1214   :  { %v546_v50 = vmul.f32 %v1602_v41, %v1602_v41  ;;  %v547_v1 = vmul.f32 %v1605_v42, %v1605_v42  ;;  %v548_v46 = vmul.f32 %v1616_v33, %v1616_v33  ;;  %v549_v8 = vmul.f32 %v1623_v0, %v1623_v0 }
0x1215   :  { %v550_v16 = vmul.f32 %v542_v43, %v1564_v55  ;;  %v551_v44 = vmul.f32 %v543_v28, %v1564_v55  ;;  %v552_v7 = vmul.f32 %v544_v49, %v1564_v55  ;;  %v553_v4 = vmul.f32 %v545_v12, %v1564_v55  ;;  %v623_v43 = vld [vmem:[%s1933_s1 + $0x30] sm:$0xff]  ;;  %v622_v28 = vld [vmem:[%s1933_s1 + $0x28] sm:$0xff] }
0x1216   :  { %v554_v47 = vmul.f32 %v546_v50, %v1564_v55  ;;  %v555_v52 = vmul.f32 %v547_v1, %v1564_v55  ;;  %v556_v56 = vmul.f32 %v548_v46, %v1564_v55  ;;  %v557_v59 = vmul.f32 %v549_v8, %v1564_v55  ;;  %688 = vmatpush.msra.mxu3 %v623_v43  ;;  %v1695_v1 = vld [vmem:[%s1933_s1 + $0x48] sm:$0xff] }
0x1217   :  { %v558_v5 = vsel %vm511_vm6, %v550_v16, 0.0  ;;  %v559_v38 = vsel %vm511_vm6, %v551_v44, 0.0  ;;  %v561_v48 = vsel %vm511_vm6, %v552_v7, 0.0  ;;  %v563_v53 = vsel %vm511_vm6, %v553_v4, 0.0  ;;  %v1676_v44 = vld [vmem:[%s1933_s1 + $0x60] sm:$0xff]  ;;  %v1681_v7 = vld [vmem:[%s1933_s1 + $0x58] sm:$0xff] }
0x1218   :  { %v560_v45 = vadd.f32 %v559_v38, %v558_v5  ;;  %v565_v57 = vsel %vm511_vm6, %v554_v47, 0.0  ;;  %v567_v60 = vsel %vm511_vm6, %v555_v52, 0.0  ;;  %v569_v62 = vsel %vm511_vm6, %v556_v56, 0.0  ;;  %689 = vmatpush.msra.mxu3 %v622_v28  ;;  %727 = vmatpush.msra.mxu1 %v1676_v44  ;;  %v1718_v4 = vld [vmem:[%s1935_s2 + $0x3] ss:$0 sm:$0xff] }
0x1219   :  { %v571_v2 = vsel %vm511_vm6, %v557_v59, 0.0  ;;  %776 = vmatpush.msra.mxu2 %v1676_v44 }
0x121a   :  { %v562_v51 = vadd.f32 %v561_v48, %v560_v45  ;;  %728 = vmatpush.msra.mxu1 %v1681_v7 }
0x121b   :  { %777 = vmatpush.msra.mxu2 %v1681_v7 }
0x121c   :  { %v564_v54 = vadd.f32 %v563_v53, %v562_v51 }
0x121e   :  { %v566_v58 = vadd.f32 %v565_v57, %v564_v54 }
0x1220   :  { %v568_v61 = vadd.f32 %v567_v60, %v566_v58 }
0x1222   :  { %v570_v63 = vadd.f32 %v569_v62, %v568_v61 }
0x1224   :  { %v572_v3 = vadd.f32 %v571_v2, %v570_v63 }
0x1226   :  { %v573_v9 = vrot.slane %v572_v3, 4 }
0x1228   :  { %v574_v10 = vadd.f32 %v573_v9, %v572_v3 }
0x122a   :  { %v575_v11 = vrot.slane %v574_v10, 2 }
0x122c   :  { %v576_v13 = vadd.f32 %v575_v11, %v574_v10 }
0x122e   :  { %v577_v15 = vrot.slane %v576_v13, 1 }
0x1230   :  { %v578_v17 = vadd.f32 %v577_v15, %v576_v13 }
0x1232   :  { %v579_v18 = vmul.f32 0.03125, %v578_v17 }
0x1234   :  { %v580_v19 = vadd.f32 1e-05, %v579_v18 }
0x1236   :  { %1304 = vrsqrt.f32 %v580_v19  ;;  %vm587_vm8 = vweird.f32 %v580_v19 }
0x123c   :  { %v1305_v20 = vpop.eup %1304 }
0x123d   :  { %v582_v21 = vmul.f32 %v1305_v20, %v580_v19  ;;  %vm588_vm7 = vweird.f32 %v1305_v20 }
0x123e   :  { %vm589_vm9 = vmor %vm587_vm8, %vm588_vm7 }
0x123f   :  { %v583_v22 = vmul.f32 %v1305_v20, %v582_v21 }
0x1241   :  { %v584_v23 = vmul.f32 0.5, %v583_v22 }
0x1243   :  { %v585_v24 = vsub.f32 1.5, %v584_v23 }
0x1245   :  { %v586_v25 = vmul.f32 %v1305_v20, %v585_v24 }
0x1247   :  { %v590_v26 = vsel %vm589_vm9, %v1305_v20, %v586_v25 }
0x1248   :  { %592 = vrot.lane.b32.xlu2 %v590_v26, %s1342_s27 }
0x1250   :  { %611 = vrot.lane.b32.xlu2 %v1267_v27, %s1344_s16 }
0x12a2   :  { %v593_v30 = vpop.permute.xlu2 %592 }
0x12a3   :  { %v595_v31 = vmul.f32 %v593_v30, %v38_v29 }
0x12a5   :  { %v596_v32 = vperm.slane %v595_v31, 0 }
0x12a7   :  { %598 = vrot.lane.b32.xlu1 %v596_v32, %s1344_s16 }
0x12aa   :  { %v1667_v12 = vpop.permute.xlu2 %611 }
0x1319   :  { %v1665_v49 = vpop.permute.xlu1 %598 }
0x131a   :  { %v601_v50 = vmul.f32 %v1665_v49, %v1590_v36  ;;  %v1688_v36 = vld [vmem:[%s1933_s1 + $0x50] sm:$0xff]  ;;  %v602_v54 = vmul.f32 %v1665_v49, %v1593_v37  ;;  %v603_v22 = vmul.f32 %v1665_v49, %v1596_v39 }
0x131b   :  { %729 = vmatpush.msra.mxu1 %v1688_v36  ;;  %778 = vmatpush.msra.mxu2 %v1688_v36 }
0x131c   :  { %v614_v16 = vadd.f32 %v1667_v12, %v601_v50  ;;  %v615_v56 = vadd.f32 %v1667_v12, %v602_v54  ;;  %v616_v23 = vadd.f32 %v1667_v12, %v603_v22 }
0x131d   :  { %730 = vmatpush.msra.mxu1 %v1695_v1  ;;  %779 = vmatpush.msra.mxu2 %v1695_v1 }
0x131e   :  { %642 = vrot.lane.b32.xlu0 %v614_v16, %s1342_s27  ;;  %731 = vmatmul.f32.vlgmr.msra.gmra.mxu1 %v1340_v6 }
0x131f   :  { %874 = vmatpush.msrb.mxu2 %v1676_v44  ;;  %825 = vmatpush.msrb.mxu1 %v1676_v44 }
0x1321   :  { %875 = vmatpush.msrb.mxu2 %v1681_v7  ;;  %826 = vmatpush.msrb.mxu1 %v1681_v7 }
0x1323   :  { %876 = vmatpush.msrb.mxu2 %v1688_v36  ;;  %827 = vmatpush.msrb.mxu1 %v1688_v36 }
0x1325   :  { %877 = vmatpush.msrb.mxu2 %v1695_v1  ;;  %828 = vmatpush.msrb.mxu1 %v1695_v1 }
0x1327   :  { %923 = vmatpush.msra.mxu1 %v1676_v44 }
0x1329   :  { %924 = vmatpush.msra.mxu1 %v1681_v7 }
0x132b   :  { %925 = vmatpush.msra.mxu1 %v1688_v36 }
0x132d   :  { %926 = vmatpush.msra.mxu1 %v1695_v1 }
0x1390   :  { %v643_v6 = vpop.permute.xlu0 %642 }
0x1391   :  { %1245 = vmatmul.msk.f32.vlgmr.msra.gmra.mxu3 %vm107_vm4, %v643_v6 }
0x139b   :  { %v732_v38 = vpop.f32.mrf.mxu1 }
0x1414   :  { %v691_v5 = vpop.f32.mrf.mxu3 }
0x1415   :  { %v692_v45 = vadd.f32 %v1718_v4, %v691_v5 }
0x1417   :  { %v735_v46 = vadd.f32 %v732_v38, %v692_v45 }
0x1419   :  { %v736_v47 = vmul.f32 0.5, %v735_v46 }
0x141b   :  { %v737_v48 = vsel %vm1420_vm3, %v735_v46, %v736_v47  ;;  %v604_v47 = vmul.f32 %v1665_v49, %v1599_v40 }
0x141c   :  { %1306 = vtanh.f32 %v737_v48 }
0x141d   :  { %v617_v48 = vadd.f32 %v1667_v12, %v604_v47 }
0x1422   :  { %v1307_v51 = vpop.eup %1306 }
0x1423   :  { %v739_v8 = vmul.f32 0.5, %v1307_v51 }
0x1425   :  { %v740_v52 = vadd.f32 0.5, %v739_v8 }
0x1427   :  { %v741_v53 = vsel %vm1420_vm3, %v1307_v51, %v740_v52 }
0x1428   :  { %744 = vrot.lane.b32.xlu1 %v741_v53, %s1341_s26  ;;  %v742_v60 = vmul.f32 0.0, %v741_v53 }
0x1430   :  { %644 = vrot.lane.b32.xlu1 %v615_v56, %s1342_s27 }
0x149a   :  { %v745_v57 = vpop.permute.xlu1 %744 }
0x149b   :  { %v747_v58 = vmul.f32 %v745_v57, %v741_v53 }
0x149d   :  { %749 = vrot.lane.b32.xlu2 %v747_v58, %s1342_s27 }
0x14a2   :  { %v645_v59 = vpop.permute.xlu1 %644 }
0x14a3   :  { %1246 = vmatmul.msk.f32.gmra.mxu3 %vm107_vm4, %v645_v59 }
0x14f7   :  { %v750_v61 = vpop.permute.xlu2 %749 }
0x14f8   :  { %v752_v62 = vadd.f32 %v750_v61, %v742_v60 }
0x14fa   :  { %1308 = vtanh.f32 %v752_v62 }
0x1500   :  { %v1309_v63 = vpop.eup %1308 }
0x1501   :  { %755 = vrot.lane.b32.xlu0 %v1309_v63, %s1341_s26 }
0x1526   :  { %v694_v9 = vpop.f32.mrf.mxu3 }
0x1527   :  { %v695_v10 = vadd.f32 %v1718_v4, %v694_v9 }
0x1573   :  { %v756_v2 = vpop.permute.xlu0 %755 }
0x1574   :  { %v1733_v37 = vmul.f32 %v756_v2, %v741_v53 }
0x1576   :  { %760 = vrot.lane.b32.xlu2 %v1733_v37, %s1342_s27  ;;  %v1102_v14 = vmul.f32 %v1733_v37, %v1564_v55 }
0x15d0   :  { %v761_v3 = vpop.permute.xlu2 %760 }
0x15d1   :  { %1253 = vmatmul.msk.f32.vlgmr.msra.gmra.mxu2 %vm107_vm4, %v761_v3 }
0x15d2   :  { %972 = vmatpush.msra.mxu2 %v1676_v44 }
0x15d4   :  { %973 = vmatpush.msra.mxu2 %v1681_v7 }
0x15d6   :  { %974 = vmatpush.msra.mxu2 %v1688_v36 }
0x15d8   :  { %975 = vmatpush.msra.mxu2 %v1695_v1 }
0x1654   :  { %v781_v11 = vpop.f32.mrf.mxu2 }
0x1655   :  { %v784_v13 = vadd.f32 %v781_v11, %v695_v10 }
0x1657   :  { %v785_v15 = vmul.f32 0.5, %v784_v13 }
0x1659   :  { %v786_v17 = vsel %vm1420_vm3, %v784_v13, %v785_v15 }
0x165a   :  { %1310 = vtanh.f32 %v786_v17 }
0x1660   :  { %v1311_v18 = vpop.eup %1310 }
0x1661   :  { %v788_v19 = vmul.f32 0.5, %v1311_v18 }
0x1663   :  { %v789_v20 = vadd.f32 0.5, %v788_v19 }
0x1665   :  { %v790_v21 = vsel %vm1420_vm3, %v1311_v18, %v789_v20 }
0x1666   :  { %793 = vrot.lane.b32.xlu0 %v790_v21, %s1341_s26  ;;  %v791_v27 = vmul.f32 %v790_v21, %v752_v62 }
0x166e   :  { %646 = vrot.lane.b32.xlu0 %v616_v23, %s1342_s27 }
0x16d8   :  { %v794_v24 = vpop.permute.xlu0 %793 }
0x16d9   :  { %v796_v25 = vmul.f32 %v794_v24, %v790_v21 }
0x16db   :  { %798 = vrot.lane.b32.xlu1 %v796_v25, %s1342_s27 }
0x16e0   :  { %v647_v26 = vpop.permute.xlu0 %646 }
0x16e1   :  { %1247 = vmatmul.msk.f32.gmra.mxu3 %vm107_vm4, %v647_v26 }
0x174d   :  { %v799_v29 = vpop.permute.xlu1 %798 }
0x174e   :  { %v801_v30 = vadd.f32 %v799_v29, %v791_v27 }
0x1750   :  { %1312 = vtanh.f32 %v801_v30 }
0x1756   :  { %v1313_v31 = vpop.eup %1312 }
0x1757   :  { %804 = vrot.lane.b32.xlu2 %v1313_v31, %s1341_s26 }
0x1764   :  { %v697_v35 = vpop.f32.mrf.mxu3 }
0x1765   :  { %v698_v43 = vadd.f32 %v1718_v4, %v697_v35  ;;  %v606_v35 = vmul.f32 %v1665_v49, %v1605_v42 }
0x17b1   :  { %v805_v32 = vpop.permute.xlu2 %804 }
0x17b2   :  { %v1755_v39 = vmul.f32 %v805_v32, %v790_v21 }
0x17b4   :  { %809 = vrot.lane.b32.xlu1 %v1755_v39, %s1342_s27 }
0x1826   :  { %v810_v34 = vpop.permute.xlu1 %809 }
0x1827   :  { %1254 = vmatmul.msk.f32.vlgmr.msrb.gmra.mxu1 %vm107_vm4, %v810_v34 }
0x1828   :  { %1021 = vmatpush.msrb.mxu1 %v1676_v44 }
0x182a   :  { %1022 = vmatpush.msrb.mxu1 %v1681_v7 }
0x182c   :  { %1023 = vmatpush.msrb.mxu1 %v1688_v36 }
0x182e   :  { %1024 = vmatpush.msrb.mxu1 %v1695_v1 }
0x18a4   :  { %v830_v28 = vpop.f32.mrf.mxu1 }
0x18a5   :  { %v833_v50 = vadd.f32 %v830_v28, %v698_v43  ;;  %v619_v43 = vadd.f32 %v1667_v12, %v606_v35 }
0x18a7   :  { %v834_v16 = vmul.f32 0.5, %v833_v50 }
0x18a9   :  { %v835_v6 = vsel %vm1420_vm3, %v833_v50, %v834_v16 }
0x18aa   :  { %1314 = vtanh.f32 %v835_v6 }
0x18b0   :  { %v1315_v5 = vpop.eup %1314 }
0x18b1   :  { %v837_v38 = vmul.f32 0.5, %v1315_v5 }
0x18b3   :  { %v838_v45 = vadd.f32 0.5, %v837_v38 }
0x18b5   :  { %v839_v46 = vsel %vm1420_vm3, %v1315_v5, %v838_v45 }
0x18b6   :  { %842 = vrot.lane.b32.xlu2 %v839_v46, %s1341_s26  ;;  %v840_v53 = vmul.f32 %v839_v46, %v801_v30 }
0x18be   :  { %648 = vrot.lane.b32.xlu2 %v617_v48, %s1342_s27 }
0x1910   :  { %v843_v51 = vpop.permute.xlu2 %842 }
0x1911   :  { %v845_v8 = vmul.f32 %v843_v51, %v839_v46 }
0x1913   :  { %847 = vrot.lane.b32.xlu0 %v845_v8, %s1342_s27 }
0x1918   :  { %v649_v52 = vpop.permute.xlu2 %648 }
0x1919   :  { %1248 = vmatmul.msk.f32.gmra.mxu3 %vm107_vm4, %v649_v52 }
0x1985   :  { %v848_v54 = vpop.permute.xlu0 %847 }
0x1986   :  { %v850_v56 = vadd.f32 %v848_v54, %v840_v53 }
0x1988   :  { %1316 = vtanh.f32 %v850_v56 }
0x198e   :  { %v1317_v57 = vpop.eup %1316 }
0x198f   :  { %853 = vrot.lane.b32.xlu1 %v1317_v57, %s1341_s26 }
0x199c   :  { %v700_v60 = vpop.f32.mrf.mxu3 }
0x199d   :  { %v701_v61 = vadd.f32 %v1718_v4, %v700_v60  ;;  %v607_v60 = vmul.f32 %v1665_v49, %v1616_v33 }
0x1a01   :  { %v854_v58 = vpop.permute.xlu1 %853 }
0x1a02   :  { %v1777_v40 = vmul.f32 %v854_v58, %v839_v46 }
0x1a04   :  { %858 = vrot.lane.b32.xlu0 %v1777_v40, %s1342_s27 }
0x1a76   :  { %v859_v59 = vpop.permute.xlu0 %858 }
0x1a77   :  { %1255 = vmatmul.msk.f32.vlgmr.msrb.gmra.mxu2 %vm107_vm4, %v859_v59 }
0x1a78   :  { %1070 = vmatpush.msrb.mxu2 %v1676_v44 }
0x1a7a   :  { %1071 = vmatpush.msrb.mxu2 %v1681_v7  ;;  %v605_v7 = vmul.f32 %v1665_v49, %v1602_v41 }
0x1a7c   :  { %1072 = vmatpush.msrb.mxu2 %v1688_v36  ;;  %v618_v36 = vadd.f32 %v1667_v12, %v605_v7 }
0x1a7e   :  { %1073 = vmatpush.msrb.mxu2 %v1695_v1 }
0x1afa   :  { %v879_v62 = vpop.f32.mrf.mxu2 }
0x1afb   :  { %v882_v63 = vadd.f32 %v879_v62, %v701_v61  ;;  %v620_v61 = vadd.f32 %v1667_v12, %v607_v60 }
0x1afd   :  { %v883_v2 = vmul.f32 0.5, %v882_v63 }
0x1aff   :  { %v884_v3 = vsel %vm1420_vm3, %v882_v63, %v883_v2 }
0x1b00   :  { %1318 = vtanh.f32 %v884_v3 }
0x1b06   :  { %v1319_v9 = vpop.eup %1318 }
0x1b07   :  { %v886_v10 = vmul.f32 0.5, %v1319_v9 }
0x1b09   :  { %v887_v11 = vadd.f32 0.5, %v886_v10 }
0x1b0b   :  { %v888_v44 = vsel %vm1420_vm3, %v1319_v9, %v887_v11 }
0x1b0c   :  { %891 = vrot.lane.b32.xlu1 %v888_v44, %s1341_s26  ;;  %v889_v17 = vmul.f32 %v888_v44, %v850_v56 }
0x1b14   :  { %650 = vrot.lane.b32.xlu1 %v618_v36, %s1342_s27 }
0x1b7e   :  { %v892_v1 = vpop.permute.xlu1 %891 }
0x1b7f   :  { %v894_v13 = vmul.f32 %v892_v1, %v888_v44 }
0x1b81   :  { %896 = vrot.lane.b32.xlu2 %v894_v13, %s1342_s27 }
0x1b86   :  { %v651_v15 = vpop.permute.xlu1 %650 }
0x1b87   :  { %1249 = vmatmul.msk.f32.gmra.mxu3 %vm107_vm4, %v651_v15 }
0x1bdb   :  { %v897_v18 = vpop.permute.xlu2 %896 }
0x1bdc   :  { %v899_v19 = vadd.f32 %v897_v18, %v889_v17 }
0x1bde   :  { %1320 = vtanh.f32 %v899_v19 }
0x1be4   :  { %v1321_v20 = vpop.eup %1320 }
0x1be5   :  { %902 = vrot.lane.b32.xlu0 %v1321_v20, %s1341_s26 }
0x1c0a   :  { %v703_v23 = vpop.f32.mrf.mxu3 }
0x1c0b   :  { %v704_v24 = vadd.f32 %v1718_v4, %v703_v23  ;;  %v608_v23 = vmul.f32 %v1665_v49, %v1623_v0 }
0x1c57   :  { %v903_v21 = vpop.permute.xlu0 %902 }
0x1c58   :  { %v1799_v41 = vmul.f32 %v903_v21, %v888_v44 }
0x1c5a   :  { %907 = vrot.lane.b32.xlu2 %v1799_v41, %s1342_s27 }
0x1cb4   :  { %v908_v22 = vpop.permute.xlu2 %907 }
0x1cb5   :  { %1256 = vmatmul.msk.f32.vlgmr.msra.gmra.mxu1 %vm107_vm4, %v908_v22 }
0x1d32   :  { %v928_v25 = vpop.f32.mrf.mxu1 }
0x1d33   :  { %v931_v26 = vadd.f32 %v928_v25, %v704_v24  ;;  %v621_v24 = vadd.f32 %v1667_v12, %v608_v23 }
0x1d35   :  { %v932_v27 = vmul.f32 0.5, %v931_v26 }
0x1d37   :  { %v933_v29 = vsel %vm1420_vm3, %v931_v26, %v932_v27 }
0x1d38   :  { %1322 = vtanh.f32 %v933_v29 }
0x1d3e   :  { %v1323_v30 = vpop.eup %1322 }
0x1d3f   :  { %v935_v31 = vmul.f32 0.5, %v1323_v30 }
0x1d41   :  { %v936_v32 = vadd.f32 0.5, %v935_v31 }
0x1d43   :  { %v937_v34 = vsel %vm1420_vm3, %v1323_v30, %v936_v32 }
0x1d44   :  { %940 = vrot.lane.b32.xlu0 %v937_v34, %s1341_s26  ;;  %v938_v6 = vmul.f32 %v937_v34, %v899_v19 }
0x1d4c   :  { %652 = vrot.lane.b32.xlu0 %v619_v43, %s1342_s27 }
0x1db6   :  { %v941_v28 = vpop.permute.xlu0 %940 }
0x1db7   :  { %v943_v50 = vmul.f32 %v941_v28, %v937_v34 }
0x1db9   :  { %945 = vrot.lane.b32.xlu1 %v943_v50, %s1342_s27 }
0x1dbe   :  { %v653_v16 = vpop.permute.xlu0 %652 }
0x1dbf   :  { %1250 = vmatmul.msk.f32.gmra.mxu3 %vm107_vm4, %v653_v16 }
0x1e2b   :  { %v946_v5 = vpop.permute.xlu1 %945 }
0x1e2c   :  { %v948_v38 = vadd.f32 %v946_v5, %v938_v6 }
0x1e2e   :  { %1324 = vtanh.f32 %v948_v38 }
0x1e34   :  { %v1325_v45 = vpop.eup %1324 }
0x1e35   :  { %951 = vrot.lane.b32.xlu2 %v1325_v45, %s1341_s26 }
0x1e42   :  { %v706_v48 = vpop.f32.mrf.mxu3 }
0x1e43   :  { %v707_v51 = vadd.f32 %v1718_v4, %v706_v48 }
0x1e8f   :  { %v952_v46 = vpop.permute.xlu2 %951 }
0x1e90   :  { %v1817_v42 = vmul.f32 %v952_v46, %v937_v34 }
0x1e92   :  { %956 = vrot.lane.b32.xlu1 %v1817_v42, %s1342_s27 }
0x1f04   :  { %v957_v47 = vpop.permute.xlu1 %956 }
0x1f05   :  { %1257 = vmatmul.msk.f32.vlgmr.msra.gmra.mxu2 %vm107_vm4, %v957_v47 }
0x1f88   :  { %v977_v8 = vpop.f32.mrf.mxu2 }
0x1f89   :  { %v980_v52 = vadd.f32 %v977_v8, %v707_v51 }
0x1f8b   :  { %v981_v53 = vmul.f32 0.5, %v980_v52 }
0x1f8d   :  { %v982_v54 = vsel %vm1420_vm3, %v980_v52, %v981_v53  ;;  %v1103_v52 = vmul.f32 %v1755_v39, %v1564_v55  ;;  %v1104_v53 = vmul.f32 %v1777_v40, %v1564_v55 }
0x1f8e   :  { %1326 = vtanh.f32 %v982_v54 }
0x1f8f   :  { %v1111_v54 = vsel %vm511_vm6, %v1103_v52, 0.0 }
0x1f94   :  { %v1327_v56 = vpop.eup %1326 }
0x1f95   :  { %v984_v57 = vmul.f32 0.5, %v1327_v56 }
0x1f97   :  { %v985_v58 = vadd.f32 0.5, %v984_v57  ;;  %v1110_v57 = vsel %vm511_vm6, %v1102_v14, 0.0 }
0x1f98   :  { %v1112_v60 = vadd.f32 %v1111_v54, %v1110_v57 }
0x1f99   :  { %v986_v59 = vsel %vm1420_vm3, %v1327_v56, %v985_v58  ;;  %v1105_v56 = vmul.f32 %v1799_v41, %v1564_v55  ;;  %v1113_v58 = vsel %vm511_vm6, %v1104_v53, 0.0 }
0x1f9a   :  { %989 = vrot.lane.b32.xlu2 %v986_v59, %s1341_s26  ;;  %v987_v3 = vmul.f32 %v986_v59, %v948_v38 }
0x1fa2   :  { %654 = vrot.lane.b32.xlu2 %v620_v61, %s1342_s27  ;;  %v1115_v61 = vsel %vm511_vm6, %v1105_v56, 0.0 }
0x1ff4   :  { %v990_v62 = vpop.permute.xlu2 %989 }
0x1ff5   :  { %v992_v63 = vmul.f32 %v990_v62, %v986_v59 }
0x1ff7   :  { %994 = vrot.lane.b32.xlu0 %v992_v63, %s1342_s27  ;;  %v1114_v63 = vadd.f32 %v1113_v58, %v1112_v60 }
0x1ffc   :  { %v655_v2 = vpop.permute.xlu2 %654 }
0x1ffd   :  { %1251 = vmatmul.msk.f32.gmra.mxu3 %vm107_vm4, %v655_v2 }
0x2069   :  { %v995_v9 = vpop.permute.xlu0 %994 }
0x206a   :  { %v997_v10 = vadd.f32 %v995_v9, %v987_v3  ;;  %v1116_v9 = vadd.f32 %v1115_v61, %v1114_v63 }
0x206c   :  { %1328 = vtanh.f32 %v997_v10 }
0x2072   :  { %v1329_v11 = vpop.eup %1328 }
0x2073   :  { %1000 = vrot.lane.b32.xlu1 %v1329_v11, %s1341_s26 }
0x2080   :  { %v709_v36 = vpop.f32.mrf.mxu3 }
0x2081   :  { %v710_v1 = vadd.f32 %v1718_v4, %v709_v36 }
0x20e5   :  { %v1001_v44 = vpop.permute.xlu1 %1000 }
0x20e6   :  { %v1835_v33 = vmul.f32 %v1001_v44, %v986_v59  ;;  %v1106_v59 = vmul.f32 %v1817_v42, %v1564_v55 }
0x20e8   :  { %1005 = vrot.lane.b32.xlu0 %v1835_v33, %s1342_s27  ;;  %v1107_v62 = vmul.f32 %v1835_v33, %v1564_v55  ;;  %v1117_v2 = vsel %vm511_vm6, %v1106_v59, 0.0 }
0x20e9   :  { %v1118_v11 = vadd.f32 %v1117_v2, %v1116_v9 }
0x215a   :  { %v1006_v7 = vpop.permute.xlu0 %1005 }
0x215b   :  { %1258 = vmatmul.msk.f32.vlgmr.msrb.gmra.mxu1 %vm107_vm4, %v1006_v7 }
0x21d8   :  { %v1026_v13 = vpop.f32.mrf.mxu1 }
0x21d9   :  { %v1029_v15 = vadd.f32 %v1026_v13, %v710_v1 }
0x21db   :  { %v1030_v17 = vmul.f32 0.5, %v1029_v15 }
0x21dd   :  { %v1031_v18 = vsel %vm1420_vm3, %v1029_v15, %v1030_v17 }
0x21de   :  { %1330 = vtanh.f32 %v1031_v18 }
0x21e4   :  { %v1331_v19 = vpop.eup %1330 }
0x21e5   :  { %v1033_v20 = vmul.f32 0.5, %v1331_v19 }
0x21e7   :  { %v1034_v21 = vadd.f32 0.5, %v1033_v20 }
0x21e9   :  { %v1035_v22 = vsel %vm1420_vm3, %v1331_v19, %v1034_v21 }
0x21ea   :  { %1038 = vrot.lane.b32.xlu1 %v1035_v22, %s1341_s26  ;;  %v1036_v29 = vmul.f32 %v1035_v22, %v997_v10  ;;  %v1119_v10 = vsel %vm511_vm6, %v1107_v62, 0.0 }
0x21eb   :  { %v1120_v1 = vadd.f32 %v1119_v10, %v1118_v11 }
0x21f2   :  { %656 = vrot.lane.b32.xlu1 %v621_v24, %s1342_s27 }
0x225c   :  { %v1039_v25 = vpop.permute.xlu1 %1038 }
0x225d   :  { %v1041_v26 = vmul.f32 %v1039_v25, %v1035_v22 }
0x225f   :  { %1043 = vrot.lane.b32.xlu2 %v1041_v26, %s1342_s27 }
0x2264   :  { %v657_v27 = vpop.permute.xlu1 %656 }
0x2265   :  { %1252 = vmatmul.msk.f32.gmra.mxu3 %vm107_vm4, %v657_v27 }
0x22b9   :  { %v1044_v30 = vpop.permute.xlu2 %1043 }
0x22ba   :  { %v1046_v31 = vadd.f32 %v1044_v30, %v1036_v29 }
0x22bc   :  { %1332 = vtanh.f32 %v1046_v31 }
0x22c2   :  { %v1333_v32 = vpop.eup %1332 }
0x22c3   :  { %1049 = vrot.lane.b32.xlu0 %v1333_v32, %s1341_s26 }
0x22e8   :  { %v712_v12 = vpop.f32.mrf.mxu3 }
0x22e9   :  { %v713_v35 = vadd.f32 %v1718_v4, %v712_v12 }
0x2335   :  { %v1050_v34 = vpop.permute.xlu0 %1049 }
0x2336   :  { %v1853_v0 = vmul.f32 %v1050_v34, %v1035_v22 }
0x2338   :  { %1054 = vrot.lane.b32.xlu2 %v1853_v0, %s1342_s27  ;;  %v1108_v3 = vmul.f32 %v1853_v0, %v1564_v55 }
0x233a   :  { %v1121_v7 = vsel %vm511_vm6, %v1108_v3, 0.0 }
0x233b   :  { %v1122_v15 = vadd.f32 %v1121_v7, %v1120_v1 }
0x2392   :  { %v1055_v49 = vpop.permute.xlu2 %1054 }
0x2393   :  { %1259 = vmatmul.msk.f32.vlgmr.msrb.gmra.mxu2 %vm107_vm4, %v1055_v49 }
0x2416   :  { %v1075_v43 = vpop.f32.mrf.mxu2 }
0x2417   :  { %v1078_v28 = vadd.f32 %v1075_v43, %v713_v35 }
0x2419   :  { %v1079_v50 = vmul.f32 0.5, %v1078_v28 }
0x241b   :  { %v1080_v16 = vsel %vm1420_vm3, %v1078_v28, %v1079_v50 }
0x241c   :  { %1334 = vtanh.f32 %v1080_v16 }
0x2422   :  { %v1335_v6 = vpop.eup %1334 }
0x2423   :  { %v1082_v5 = vmul.f32 0.5, %v1335_v6 }
0x2425   :  { %v1083_v38 = vadd.f32 0.5, %v1082_v5 }
0x2427   :  { %v1084_v45 = vsel %vm1420_vm3, %v1335_v6, %v1083_v38 }
0x2428   :  { %1087 = vrot.lane.b32.xlu0 %v1084_v45, %s1341_s26  ;;  %v1085_v4 = vmul.f32 %v1084_v45, %v1046_v31 }
0x249a   :  { %v1088_v46 = vpop.permute.xlu0 %1087 }
0x249b   :  { %v1090_v47 = vmul.f32 %v1088_v46, %v1084_v45 }
0x249d   :  { %1092 = vrot.lane.b32.xlu1 %v1090_v47, %s1342_s27 }
0x250f   :  { %v1093_v48 = vpop.permute.xlu1 %1092 }
0x2510   :  { %v1095_v51 = vadd.f32 %v1093_v48, %v1085_v4 }
0x2512   :  { %1336 = vtanh.f32 %v1095_v51 }
0x2518   :  { %v1337_v8 = vpop.eup %1336 }
0x2519   :  { %1098 = vrot.lane.b32.xlu2 %v1337_v8, %s1341_s26 }
0x2573   :  { %v1099_v44 = vpop.permute.xlu2 %1098 }
0x2574   :  { %v1101_v36 = vmul.f32 %v1099_v44, %v1084_v45 }
0x2576   :  { %v1109_v13 = vmul.f32 %v1101_v36, %v1564_v55 }
0x2578   :  { %v1123_v17 = vsel %vm511_vm6, %v1109_v13, 0.0 }
0x2579   :  { %v1124_v18 = vadd.f32 %v1123_v17, %v1122_v15  ;;  %v1269_v15 = vld [vmem:[%s1935_s2 + $0x6] ss:$0 sm:$0xff]  ;;  %v1270_v17 = vld [vmem:[%s1935_s2 + $0x5] ss:$0 sm:$0xff] }
0x257a   :  { %1202 = vrot.lane.b32.xlu2 %v1270_v17, %s1344_s16 }
0x257b   :  { %v1125_v19 = vrot.slane %v1124_v18, 4 }
0x257d   :  { %v1126_v20 = vadd.f32 %v1125_v19, %v1124_v18  ;;  %v631_v18 = vld [vmem:[%s1935_s2 + $0x4] sm:$0x1] }
0x257f   :  { %v1127_v21 = vrot.slane %v1126_v20, 2 }
0x2581   :  { %v1128_v22 = vadd.f32 %v1127_v21, %v1126_v20 }
0x2583   :  { %v1129_v23 = vrot.slane %v1128_v22, 1 }
0x2585   :  { %v1130_v24 = vadd.f32 %v1129_v23, %v1128_v22 }
0x2587   :  { %v1131_v25 = vmul.f32 0.03125, %v1130_v24 }
0x2589   :  { %v1132_v26 = vsub.f32 %v1733_v37, %v1131_v25  ;;  %v1133_v27 = vsub.f32 %v1755_v39, %v1131_v25  ;;  %v1134_v29 = vsub.f32 %v1777_v40, %v1131_v25  ;;  %v1135_v30 = vsub.f32 %v1799_v41, %v1131_v25 }
0x258a   :  { %v1136_v31 = vsub.f32 %v1817_v42, %v1131_v25  ;;  %v1137_v32 = vsub.f32 %v1835_v33, %v1131_v25  ;;  %v1138_v43 = vsub.f32 %v1853_v0, %v1131_v25  ;;  %v1139_v40 = vsub.f32 %v1101_v36, %v1131_v25 }
0x258b   :  { %v1140_v34 = vmul.f32 %v1132_v26, %v1132_v26  ;;  %v1141_v49 = vmul.f32 %v1133_v27, %v1133_v27  ;;  %v1142_v12 = vmul.f32 %v1134_v29, %v1134_v29  ;;  %v1143_v35 = vmul.f32 %v1135_v30, %v1135_v30 }
0x258c   :  { %v1144_v28 = vmul.f32 %v1136_v31, %v1136_v31  ;;  %v1145_v16 = vmul.f32 %v1137_v32, %v1137_v32  ;;  %v1146_v5 = vmul.f32 %v1138_v43, %v1138_v43  ;;  %v1147_v46 = vmul.f32 %v1139_v40, %v1139_v40  ;;  %v1271_v31 = vld [vmem:[%s1935_s2 + $0x7] ss:$0 sm:$0xff] }
0x258d   :  { %v1148_v50 = vmul.f32 %v1140_v34, %v1564_v55  ;;  %v1149_v37 = vmul.f32 %v1141_v49, %v1564_v55  ;;  %v1150_v39 = vmul.f32 %v1142_v12, %v1564_v55  ;;  %v1151_v41 = vmul.f32 %v1143_v35, %v1564_v55 }
0x258e   :  { %v1152_v38 = vmul.f32 %v1144_v28, %v1564_v55  ;;  %v1153_v47 = vmul.f32 %v1145_v16, %v1564_v55  ;;  %v1154_v51 = vmul.f32 %v1146_v5, %v1564_v55  ;;  %v1155_v14 = vmul.f32 %v1147_v46, %v1564_v55 }
0x258f   :  { %v1156_v42 = vsel %vm511_vm6, %v1148_v50, 0.0  ;;  %v1157_v33 = vsel %vm511_vm6, %v1149_v37, 0.0  ;;  %v1159_v0 = vsel %vm511_vm6, %v1150_v39, 0.0  ;;  %v1161_v4 = vsel %vm511_vm6, %v1151_v41, 0.0 }
0x2590   :  { %v1158_v6 = vadd.f32 %v1157_v33, %v1156_v42  ;;  %v1163_v8 = vsel %vm511_vm6, %v1152_v38, 0.0  ;;  %v1165_v53 = vsel %vm511_vm6, %v1153_v47, 0.0  ;;  %v1167_v56 = vsel %vm511_vm6, %v1154_v51, 0.0 }
0x2591   :  { %v1169_v58 = vsel %vm511_vm6, %v1155_v14, 0.0 }
0x2592   :  { %v1160_v45 = vadd.f32 %v1159_v0, %v1158_v6 }
0x2594   :  { %v1162_v48 = vadd.f32 %v1161_v4, %v1160_v45 }
0x2596   :  { %v1164_v52 = vadd.f32 %v1163_v8, %v1162_v48 }
0x2598   :  { %v1166_v54 = vadd.f32 %v1165_v53, %v1164_v52 }
0x259a   :  { %v1168_v57 = vadd.f32 %v1167_v56, %v1166_v54 }
0x259c   :  { %v1170_v59 = vadd.f32 %v1169_v58, %v1168_v57 }
0x259e   :  { %v1171_v60 = vrot.slane %v1170_v59, 4 }
0x25a0   :  { %v1172_v61 = vadd.f32 %v1171_v60, %v1170_v59 }
0x25a2   :  { %v1173_v62 = vrot.slane %v1172_v61, 2 }
0x25a4   :  { %v1174_v63 = vadd.f32 %v1173_v62, %v1172_v61 }
0x25a6   :  { %v1175_v2 = vrot.slane %v1174_v63, 1 }
0x25a8   :  { %v1176_v3 = vadd.f32 %v1175_v2, %v1174_v63 }
0x25aa   :  { %v1177_v9 = vmul.f32 0.03125, %v1176_v3 }
0x25ac   :  { %v1178_v10 = vadd.f32 1e-05, %v1177_v9 }
0x25ae   :  { %1338 = vrsqrt.f32 %v1178_v10  ;;  %vm1185_vm11 = vweird.f32 %v1178_v10 }
0x25b4   :  { %v1339_v11 = vpop.eup %1338 }
0x25b5   :  { %v1180_v55 = vmul.f32 %v1339_v11, %v1178_v10  ;;  %vm1186_vm10 = vweird.f32 %v1339_v11 }
0x25b6   :  { %vm1187_vm12 = vmor %vm1185_vm11, %vm1186_vm10 }
0x25b7   :  { %v1181_v44 = vmul.f32 %v1339_v11, %v1180_v55 }
0x25b9   :  { %v1182_v7 = vmul.f32 0.5, %v1181_v44 }
0x25bb   :  { %v1183_v36 = vsub.f32 1.5, %v1182_v7 }
0x25bd   :  { %v1184_v1 = vmul.f32 %v1339_v11, %v1183_v36 }
0x25bf   :  { %v1188_v13 = vsel %vm1187_vm12, %v1339_v11, %v1184_v1 }
0x25c0   :  { %1190 = vrot.lane.b32.xlu0 %v1188_v13, %s1342_s27 }
0x25c8   :  { %1210 = vrot.lane.b32.xlu0 %v1269_v15, %s1344_s16 }
0x25d4   :  { %v1203_v23 = vpop.permute.xlu2 %1202 }
0x2632   :  { %v1191_v19 = vpop.permute.xlu0 %1190 }
0x2633   :  { %v1193_v20 = vmul.f32 %v1191_v19, %v631_v18 }
0x2635   :  { %v1194_v21 = vperm.slane %v1193_v20, 0 }
0x2637   :  { %1196 = vrot.lane.b32.xlu1 %v1194_v21, %s1344_s16 }
0x263a   :  { %v1211_v25 = vpop.permute.xlu0 %1210 }
0x26a9   :  { %v1197_v22 = vpop.permute.xlu1 %1196 }
0x26aa   :  { %v1199_v24 = vmul.f32 %v1197_v22, %v1139_v40 }
0x26ac   :  { %v1205_v26 = vadd.f32 %v1203_v23, %v1199_v24 }
0x26ae   :  { %v1213_v27 = vmul.f32 %v1211_v25, %v1205_v26 }
0x26b0   :  { %1215 = vrot.lane.b32.xlu1 %v1213_v27, %s1342_s27 }
0x2722   :  { %v1216_v29 = vpop.permute.xlu1 %1215 }
0x2723   :  { %v1218_v30 = vsel %vm107_vm4, %v1216_v29, 0.0 }
0x2724   :  { %1219 = vadd.xlane.f32.xlu2 %v1218_v30 }
0x2797   :  { %v1220_v32 = vpop.xlane.xlu2 %1219 }
0x2798   :  { %v1222_v34 = vadd.f32 %v1271_v31, %v1220_v32 }
0x279a   :  { %1224 = vst.msk [vmem:[%s1936_s3] sm:$0xf] %vm1223_vm13, %v1222_v34 }

</bundles_post_ra>
